<compile_context>
chip_gen: v6e
topology: v6e:2x2x1
jax: 0.10.0
libtpu: 0.0.40
codegen_flags: <defaults>
</compile_context>

<pallas_src>
import functools

import jax
import jax.numpy as jnp
from jax.experimental import pallas as pl
from jax.experimental.pallas import tpu as pltpu


def _layer_norm(x, g, b, eps=1e-5):
    mu = jnp.mean(x, axis=-1, keepdims=True)
    var = jnp.mean((x - mu) ** 2, axis=-1, keepdims=True)
    return (x - mu) * jax.lax.rsqrt(var + eps) * g + b


def _vmem_limit_bytes():
    """Generation-aware VMEM budget: ~80% of physical per-core VMEM.

    ~51 MiB on v7x (64 MiB physical), ~102 MiB on v5e/v6e (128 MiB physical).
    """
    try:
        cap = pltpu.get_tpu_info().vmem_capacity_bytes
    except Exception:
        cap = 64 * 1024 * 1024   # conservative: fits every generation
    return int(cap * 0.8)


def transformer_block_kernel(x_ref, bias_ref,
                             wqkv_ref, wo_ref, bo_ref,
                             g1_ref, be1_ref,
                             w1_ref, bf1_ref, w2_ref, bf2_ref,
                             g2_ref, be2_ref,
                             o_ref, *, heads, head_dim):
    Bt, S, E = x_ref.shape
    H, D = heads, head_dim

    # ---- hoist small parameter / bias loads once (no per-use re-reads) ----
    bo, g1, be1 = bo_ref[...], g1_ref[...], be1_ref[...]
    bf1, bf2 = bf1_ref[...], bf2_ref[...]
    g2, be2 = g2_ref[...], be2_ref[...]
    wo_all = wo_ref[...]                    # (H, D, E) bf16, per-head fc_out rows
    bias = bias_ref[...]                    # (Bt, 1, Sk) additive key-padding bias, f32

    x = x_ref[...]                          # (Bt, S, E) f32
    x2d = x.reshape(Bt * S, E)
    x_bf = x2d.astype(jnp.bfloat16)

    # ---- fused Q/K/V projection: ONE (Bt*S, E) x (E, 3E) MXU matmul.
    # wqkv holds block-diagonal copies of the shared per-head (D, D) weights;
    # the 1/sqrt(E) softmax scale is folded into the Q block (wrapper side).
    qkv = jnp.dot(x_bf, wqkv_ref[...], preferred_element_type=jnp.float32)
    q3 = qkv[:, 0 * E:1 * E].reshape(Bt, S, E).astype(jnp.bfloat16)
    k3 = qkv[:, 1 * E:2 * E].reshape(Bt, S, E).astype(jnp.bfloat16)
    v3 = qkv[:, 2 * E:3 * E].reshape(Bt, S, E).astype(jnp.bfloat16)

    # ---- multi-head scaled-dot-product attention fused with fc_out.
    # NOTE: the per-head loop remains (a batched dot_general is the same per-(b,h)
    # MXU work); the concat of lane-sparse head slices is replaced by accumulating
    # the output projection per head, so no lane-shuffled copies are materialized.
    proj = jnp.zeros((Bt * S, E), jnp.float32)
    for h in range(H):
        sl = slice(h * D, (h + 1) * D)
        qh, kh, vh = q3[:, :, sl], k3[:, :, sl], v3[:, :, sl]       # (Bt, S, D) bf16
        s = jnp.einsum('bqd,bkd->bqk', qh, kh,
                       preferred_element_type=jnp.float32)           # (Bt, Sq, Sk) f32
        s = s + bias                                                  # bias added in f32
        m = jnp.max(s, axis=-1, keepdims=True)
        p = jnp.exp(s - m)
        attn = p * pl.reciprocal(jnp.sum(p, axis=-1, keepdims=True), approx=True)
        head_out = jnp.einsum('bqk,bkd->bqd', attn.astype(jnp.bfloat16), vh,
                              preferred_element_type=jnp.float32)     # (Bt, S, D) f32
        proj = proj + jnp.dot(head_out.reshape(Bt * S, D).astype(jnp.bfloat16),
                              wo_all[h], preferred_element_type=jnp.float32)
    attn_out = proj + bo

    # ---- residual + LayerNorm 1 (dropout == identity), f32 math ----
    xn = _layer_norm(attn_out + x2d, g1, be1)

    # ---- feed-forward: Linear -> ReLU -> Linear (bf16 matmuls, f32 accumulate) ----
    # TODO(synk): at production sizes (E~1024, F=4E, long S) K-tile the FFN on an
    # extra 'arbitrary' grid axis (or split it into its own pallas_call) so w1/w2
    # and the (Bt*S, F) f32 hidden are never simultaneously VMEM-resident (v7x 64 MiB).
    hdn = jnp.dot(xn.astype(jnp.bfloat16), w1_ref[...],
                  preferred_element_type=jnp.float32) + bf1
    hdn = jnp.maximum(hdn, 0.0)
    ff = jnp.dot(hdn.astype(jnp.bfloat16), w2_ref[...],
                 preferred_element_type=jnp.float32) + bf2

    # ---- residual + LayerNorm 2 (dropout == identity) ----
    o_ref[...] = _layer_norm(ff + xn, g2, be2).reshape(Bt, S, E)


def _prepare_layer(p, heads, embed_size):
    """Wrapper-side reparametrization of the torch-style layer params (done once).

    - Per-head (D, D) Q/K/V weights -> block-diagonal (E, E), concatenated into one
      fused (E, 3E) wqkv so the projection is a single MXU matmul.
    - The 1/sqrt(embed_size) attention scale is folded into the Q block.
    - fc_out weight reshaped to (H, D, E) for the per-head projection accumulation.
    - Matmul weights cast to bf16 (accumulation stays f32 in-kernel).

    TODO(synk): for production D >= 128, replace the kron block-diagonal weights with
    a reshaped (Bt*S*H, D) x (D, D) matmul to avoid the H-fold wasted FLOPs; kron is
    kept here because D = E/heads is tiny and lane density dominates.
    """
    E = embed_size
    D = E // heads
    eye = jnp.eye(heads, dtype=jnp.float32)
    scale = jnp.float32(1.0 / (E ** 0.5))
    wq = jnp.kron(eye, p["wq"]) * scale
    wk = jnp.kron(eye, p["wk"])
    wv = jnp.kron(eye, p["wv"])
    return {
        "wqkv": jnp.concatenate([wq, wk, wv], axis=1).astype(jnp.bfloat16),  # (E, 3E)
        "wo": p["wo"].reshape(heads, D, E).astype(jnp.bfloat16),             # (H, D, E)
        "bo": p["bo"],
        "g1": p["g1"], "be1": p["be1"],
        "w1": p["w1"].astype(jnp.bfloat16), "bf1": p["bf1"],
        "w2": p["w2"].astype(jnp.bfloat16), "bf2": p["bf2"],
        "g2": p["g2"], "be2": p["be2"],
    }


def transformer_block(x, bias, p, heads, *, batch_tile=None):
    """One TransformerBlock forward via pallas_call; grid over batch tiles."""
    N, S, E = x.shape
    D = E // heads
    kp = _prepare_layer(p, heads, E)
    F = kp["w1"].shape[1]

    if batch_tile is None:
        # Largest tile (<= 8) that still leaves >= 2 grid steps when N >= 2:
        # a multi-step grid keeps both v7x TensorCores busy ('parallel' axis) and
        # enables input/output DMA <-> compute overlap.  At production sizes raise
        # the cap so Bt*S >= 256 to fill the MXU rows (>=128 on v5e).
        batch_tile = min(8, max(1, N // 2)) if N >= 2 else N
    while N % batch_tile:
        batch_tile -= 1
    Bt = batch_tile

    kernel = functools.partial(transformer_block_kernel, heads=heads, head_dim=D)

    def run(single_buffer_weights):
        def const_spec(shape):
            nd = len(shape)
            idx = lambda n, _nd=nd: (0,) * _nd
            if single_buffer_weights:
                # Weights/biases never change across the batch grid: single-buffer
                # them so the pipeline does not allocate a dead second VMEM copy
                # (halves weight VMEM; matters on v7x's 64 MiB VMEM).
                return pl.BlockSpec(shape, idx, pipeline_mode=pl.Buffered(1))
            return pl.BlockSpec(shape, idx)

        in_specs = [
            pl.BlockSpec((Bt, S, E), lambda n: (n, 0, 0)),   # x
            pl.BlockSpec((Bt, 1, S), lambda n: (n, 0, 0)),   # additive mask bias
            const_spec((E, 3 * E)),      # fused wqkv (block-diag, scale folded, bf16)
            const_spec((heads, D, E)),   # fc_out weight, per-head rows
            const_spec((1, E)),          # fc_out bias
            const_spec((1, E)),          # norm1 gamma
            const_spec((1, E)),          # norm1 beta
            const_spec((E, F)),          # ff w1
            const_spec((1, F)),          # ff b1
            const_spec((F, E)),          # ff w2
            const_spec((1, E)),          # ff b2
            const_spec((1, E)),          # norm2 gamma
            const_spec((1, E)),          # norm2 beta
        ]

        return pl.pallas_call(
            kernel,
            out_shape=jax.ShapeDtypeStruct((N, S, E), jnp.float32),
            grid=(N // Bt,),
            in_specs=in_specs,
            out_specs=pl.BlockSpec((Bt, S, E), lambda n: (n, 0, 0)),
            compiler_params=pltpu.CompilerParams(
                dimension_semantics=("parallel",),
                vmem_limit_bytes=_vmem_limit_bytes()),
        )(x, bias,
          kp["wqkv"], kp["wo"], kp["bo"],
          kp["g1"], kp["be1"],
          kp["w1"], kp["bf1"], kp["w2"], kp["bf2"],
          kp["g2"], kp["be2"])

    try:
        return run(True)
    except Exception:
        # This JAX/Mosaic build rejected pipeline_mode=pl.Buffered(1); fall back to
        # the default (double-buffered) constant-weight specs.
        return run(False)


def init_encoder_params(key, src_sent_size, embed_size, num_layers, heads,
                        forward_expansion, max_length):
    """Torch-style parameters (f32, shared per-head (D, D) Q/K/V weights)."""
    D = embed_size // heads
    F = forward_expansion * embed_size
    keys = jax.random.split(key, 2 + num_layers)

    params = {
        "tok_emb": 0.1 * jax.random.normal(keys[0], (src_sent_size, embed_size), jnp.float32),
        "pos_emb": 0.1 * jax.random.normal(keys[1], (max_length, embed_size), jnp.float32),
        "layers": [],
    }
    for l in range(num_layers):
        lk = jax.random.split(keys[2 + l], 7)
        params["layers"].append({
            "wq": 0.2 * jax.random.normal(lk[0], (D, D), jnp.float32),
            "wk": 0.2 * jax.random.normal(lk[1], (D, D), jnp.float32),
            "wv": 0.2 * jax.random.normal(lk[2], (D, D), jnp.float32),
            "wo": 0.1 * jax.random.normal(lk[3], (embed_size, embed_size), jnp.float32),
            "bo": jnp.zeros((1, embed_size), jnp.float32),
            "g1": jnp.ones((1, embed_size), jnp.float32),
            "be1": jnp.zeros((1, embed_size), jnp.float32),
            "w1": 0.1 * jax.random.normal(lk[4], (embed_size, F), jnp.float32),
            "bf1": jnp.zeros((1, F), jnp.float32),
            "w2": 0.1 * jax.random.normal(lk[5], (F, embed_size), jnp.float32),
            "bf2": jnp.zeros((1, embed_size), jnp.float32),
            "g2": jnp.ones((1, embed_size), jnp.float32),
            "be2": jnp.zeros((1, embed_size), jnp.float32),
        })
    return params


def encoder_forward(tokens, mask, params, heads):
    """Encoder.forward: token + position embeddings, then num_layers TransformerBlocks.

    tokens: (N, S) int32; mask: (N, S) float32 key-padding mask (0 => masked).
    Dropout is identity (eval mode).
    """
    N, S = tokens.shape
    tok = jnp.take(params["tok_emb"], tokens, axis=0)          # (N, S, E)  gather (glue)
    pos = params["pos_emb"][:S][None, :, :]                    # positions = arange(S)
    out = tok + pos
    # Additive attention bias (0 / -1e20), computed ONCE and shared by every layer;
    # shape (N, 1, S) so the kernel block's trailing dims equal the full array dims.
    bias = jnp.where(mask == 0.0, jnp.float32(-1e20), jnp.float32(0.0))[:, None, :]
    # TODO(synk): v5e — prefetch layer l+1's weights across pallas_calls (cross-call
    # semaphore futures) so per-layer weight DMAs hide behind layer l's compute.
    for p in params["layers"]:
        out = transformer_block(out, bias, p, heads)
    return out


if __name__ == "__main__":
    # Small, forward-consistent shapes.  NOTE: E=32 is lane-sparse on TPU (stores
    # use 32/128 lanes); real models with E a multiple of 128 are lane-dense.
    src_sent_size = 50
    embed_size = 32
    num_layers = 2
    heads = 4
    forward_expansion = 4
    max_length = 16
    N, S = 2, 8

    key = jax.random.PRNGKey(0)
    kp, kt = jax.random.split(key)
    params = init_encoder_params(kp, src_sent_size, embed_size, num_layers,
                                 heads, forward_expansion, max_length)

    tokens = jax.random.randint(kt, (N, S), 0, src_sent_size, dtype=jnp.int32)
    # Padding-style mask: last two positions of batch element 1 are masked out.
    mask = jnp.ones((N, S), jnp.float32).at[1, -2:].set(0.0)

    out = encoder_forward(tokens, mask, params, heads)
    out = jax.block_until_ready(out)
    assert out.shape == (N, S, embed_size) and out.dtype == jnp.float32
    assert bool(jnp.all(jnp.isfinite(out)))
    print("KERNEL_OK")
</pallas_src>

<mosaic_0001>
module attributes {stable_mosaic.version = 11 : i64} {
  func.func @transformer_block_kernel(%arg0: i32, %arg1: memref<1x8x32xf32, #tpu.memory_space<vmem>>, %arg2: memref<1x1x8xf32, #tpu.memory_space<vmem>>, %arg3: memref<32x96xbf16, #tpu.memory_space<vmem>>, %arg4: memref<4x8x32xbf16, #tpu.memory_space<vmem>>, %arg5: memref<1x32xf32, #tpu.memory_space<vmem>>, %arg6: memref<1x32xf32, #tpu.memory_space<vmem>>, %arg7: memref<1x32xf32, #tpu.memory_space<vmem>>, %arg8: memref<32x128xbf16, #tpu.memory_space<vmem>>, %arg9: memref<1x128xf32, #tpu.memory_space<vmem>>, %arg10: memref<128x32xbf16, #tpu.memory_space<vmem>>, %arg11: memref<1x32xf32, #tpu.memory_space<vmem>>, %arg12: memref<1x32xf32, #tpu.memory_space<vmem>>, %arg13: memref<1x32xf32, #tpu.memory_space<vmem>>, %arg14: memref<1x8x32xf32, #tpu.memory_space<vmem>>) attributes {dimension_semantics = [#tpu.dimension_semantics<parallel>], iteration_bounds = array<i64: 2>, scalar_prefetch = 0 : i64, scratch_operands = 0 : i64, tpu.core_type = #tpu.core_type<tc>, window_params = [{transform_indices = @transform_0, window_bounds = array<i64: 1, 8, 32>}, {transform_indices = @transform_1, window_bounds = array<i64: 1, 1, 8>}, {pipeline_mode = #tpu.pipeline_mode<synchronous>, transform_indices = @transform_2, window_bounds = array<i64: 32, 96>}, {pipeline_mode = #tpu.pipeline_mode<synchronous>, transform_indices = @transform_3, window_bounds = array<i64: 4, 8, 32>}, {pipeline_mode = #tpu.pipeline_mode<synchronous>, transform_indices = @transform_4, window_bounds = array<i64: 1, 32>}, {pipeline_mode = #tpu.pipeline_mode<synchronous>, transform_indices = @transform_5, window_bounds = array<i64: 1, 32>}, {pipeline_mode = #tpu.pipeline_mode<synchronous>, transform_indices = @transform_6, window_bounds = array<i64: 1, 32>}, {pipeline_mode = #tpu.pipeline_mode<synchronous>, transform_indices = @transform_7, window_bounds = array<i64: 32, 128>}, {pipeline_mode = #tpu.pipeline_mode<synchronous>, transform_indices = @transform_8, window_bounds = array<i64: 1, 128>}, {pipeline_mode = #tpu.pipeline_mode<synchronous>, transform_indices = @transform_9, window_bounds = array<i64: 128, 32>}, {pipeline_mode = #tpu.pipeline_mode<synchronous>, transform_indices = @transform_10, window_bounds = array<i64: 1, 32>}, {pipeline_mode = #tpu.pipeline_mode<synchronous>, transform_indices = @transform_11, window_bounds = array<i64: 1, 32>}, {pipeline_mode = #tpu.pipeline_mode<synchronous>, transform_indices = @transform_12, window_bounds = array<i64: 1, 32>}, {transform_indices = @transform_13, window_bounds = array<i64: 1, 8, 32>}]} {
    %c0 = arith.constant 0 : index
    %c0_0 = arith.constant 0 : index
    %0 = vector.load %arg5[%c0, %c0_0] : memref<1x32xf32, #tpu.memory_space<vmem>>, vector<1x32xf32>
    %c0_1 = arith.constant 0 : index
    %c0_2 = arith.constant 0 : index
    %1 = vector.load %arg6[%c0_1, %c0_2] : memref<1x32xf32, #tpu.memory_space<vmem>>, vector<1x32xf32>
    %c0_3 = arith.constant 0 : index
    %c0_4 = arith.constant 0 : index
    %2 = vector.load %arg7[%c0_3, %c0_4] : memref<1x32xf32, #tpu.memory_space<vmem>>, vector<1x32xf32>
    %c0_5 = arith.constant 0 : index
    %c0_6 = arith.constant 0 : index
    %3 = vector.load %arg9[%c0_5, %c0_6] : memref<1x128xf32, #tpu.memory_space<vmem>>, vector<1x128xf32>
    %c0_7 = arith.constant 0 : index
    %c0_8 = arith.constant 0 : index
    %4 = vector.load %arg11[%c0_7, %c0_8] : memref<1x32xf32, #tpu.memory_space<vmem>>, vector<1x32xf32>
    %c0_9 = arith.constant 0 : index
    %c0_10 = arith.constant 0 : index
    %5 = vector.load %arg12[%c0_9, %c0_10] : memref<1x32xf32, #tpu.memory_space<vmem>>, vector<1x32xf32>
    %c0_11 = arith.constant 0 : index
    %c0_12 = arith.constant 0 : index
    %6 = vector.load %arg13[%c0_11, %c0_12] : memref<1x32xf32, #tpu.memory_space<vmem>>, vector<1x32xf32>
    %c0_13 = arith.constant 0 : index
    %c0_14 = arith.constant 0 : index
    %c0_15 = arith.constant 0 : index
    %7 = vector.load %arg4[%c0_13, %c0_14, %c0_15] : memref<4x8x32xbf16, #tpu.memory_space<vmem>>, vector<4x8x32xbf16>
    %c0_16 = arith.constant 0 : index
    %c0_17 = arith.constant 0 : index
    %c0_18 = arith.constant 0 : index
    %8 = vector.load %arg2[%c0_16, %c0_17, %c0_18] : memref<1x1x8xf32, #tpu.memory_space<vmem>>, vector<1x1x8xf32>
    %c0_19 = arith.constant 0 : index
    %c0_20 = arith.constant 0 : index
    %c0_21 = arith.constant 0 : index
    %9 = vector.load %arg1[%c0_19, %c0_20, %c0_21] : memref<1x8x32xf32, #tpu.memory_space<vmem>>, vector<1x8x32xf32>
    %10 = vector.shape_cast %9 : vector<1x8x32xf32> to vector<8x32xf32>
    %11 = arith.truncf %10 : vector<8x32xf32> to vector<8x32xbf16>
    %c0_22 = arith.constant 0 : index
    %c0_23 = arith.constant 0 : index
    %12 = vector.load %arg3[%c0_22, %c0_23] : memref<32x96xbf16, #tpu.memory_space<vmem>>, vector<32x96xbf16>
    %cst = arith.constant dense<0.000000e+00> : vector<8x96xf32>
    %13 = tpu.matmul %11, %12, %cst {dimension_numbers = #tpu.dot_dimension_numbers<[1], [0], [0], [1], [0, 0, 1, 1], [], []>} : vector<8x32xbf16>, vector<32x96xbf16>, vector<8x96xf32> -> vector<8x96xf32>
    %14 = vector.extract_strided_slice %13 {offsets = [0, 0], sizes = [8, 32], strides = [1, 1]} : vector<8x96xf32> to vector<8x32xf32>
    %15 = vector.shape_cast %14 : vector<8x32xf32> to vector<1x8x32xf32>
    %16 = arith.truncf %15 : vector<1x8x32xf32> to vector<1x8x32xbf16>
    %17 = vector.extract_strided_slice %13 {offsets = [0, 32], sizes = [8, 32], strides = [1, 1]} : vector<8x96xf32> to vector<8x32xf32>
    %18 = vector.shape_cast %17 : vector<8x32xf32> to vector<1x8x32xf32>
    %19 = arith.truncf %18 : vector<1x8x32xf32> to vector<1x8x32xbf16>
    %20 = vector.extract_strided_slice %13 {offsets = [0, 64], sizes = [8, 32], strides = [1, 1]} : vector<8x96xf32> to vector<8x32xf32>
    %21 = vector.shape_cast %20 : vector<8x32xf32> to vector<1x8x32xf32>
    %22 = arith.truncf %21 : vector<1x8x32xf32> to vector<1x8x32xbf16>
    %cst_24 = arith.constant 0.000000e+00 : f32
    %23 = vector.broadcast %cst_24 : f32 to vector<8x32xf32>
    %24 = vector.extract_strided_slice %16 {offsets = [0, 0, 0], sizes = [1, 8, 8], strides = [1, 1, 1]} : vector<1x8x32xbf16> to vector<1x8x8xbf16>
    %25 = vector.extract_strided_slice %19 {offsets = [0, 0, 0], sizes = [1, 8, 8], strides = [1, 1, 1]} : vector<1x8x32xbf16> to vector<1x8x8xbf16>
    %26 = vector.extract_strided_slice %22 {offsets = [0, 0, 0], sizes = [1, 8, 8], strides = [1, 1, 1]} : vector<1x8x32xbf16> to vector<1x8x8xbf16>
    "tpu.trace_start"() <{level = 10 : i32, message = "bqd,bkd->bqk"}> : () -> ()
    %cst_25 = arith.constant dense<0.000000e+00> : vector<1x8x8xf32>
    %27 = tpu.matmul %24, %25, %cst_25 {dimension_numbers = #tpu.dot_dimension_numbers<[2], [2], [1], [1], [0, 0, 0, 1, 1, 1], [0], [0]>} : vector<1x8x8xbf16>, vector<1x8x8xbf16>, vector<1x8x8xf32> -> vector<1x8x8xf32>
    "tpu.trace_stop"() : () -> ()
    %28 = vector.broadcast %8 : vector<1x1x8xf32> to vector<1x8x8xf32>
    %29 = arith.addf %27, %28 : vector<1x8x8xf32>
    %cst_26 = arith.constant dense<0xFF800000> : vector<1x8xf32>
    %30 = vector.multi_reduction <maximumf>, %29, %cst_26 [2] : vector<1x8x8xf32> to vector<1x8xf32>
    %31 = vector.shape_cast %30 : vector<1x8xf32> to vector<1x8x1xf32>
    %32 = vector.broadcast %31 : vector<1x8x1xf32> to vector<1x8x8xf32>
    %33 = arith.subf %29, %32 : vector<1x8x8xf32>
    %34 = math.exp %33 : vector<1x8x8xf32>
    %cst_27 = arith.constant dense<0.000000e+00> : vector<1x8xf32>
    %35 = vector.multi_reduction <add>, %34, %cst_27 [2] : vector<1x8x8xf32> to vector<1x8xf32>
    %36 = vector.shape_cast %35 : vector<1x8xf32> to vector<1x8x1xf32>
    %37 = tpu.reciprocal %36 {approx = true} : vector<1x8x1xf32> -> vector<1x8x1xf32>
    %38 = vector.broadcast %37 : vector<1x8x1xf32> to vector<1x8x8xf32>
    %39 = arith.mulf %34, %38 : vector<1x8x8xf32>
    %40 = arith.truncf %39 : vector<1x8x8xf32> to vector<1x8x8xbf16>
    "tpu.trace_start"() <{level = 10 : i32, message = "bqk,bkd->bqd"}> : () -> ()
    %cst_28 = arith.constant dense<0.000000e+00> : vector<1x8x8xf32>
    %41 = tpu.matmul %40, %26, %cst_28 {dimension_numbers = #tpu.dot_dimension_numbers<[2], [1], [1], [2], [0, 0, 0, 1, 1, 2], [0], [0]>} : vector<1x8x8xbf16>, vector<1x8x8xbf16>, vector<1x8x8xf32> -> vector<1x8x8xf32>
    "tpu.trace_stop"() : () -> ()
    %42 = vector.shape_cast %41 : vector<1x8x8xf32> to vector<8x8xf32>
    %43 = arith.truncf %42 : vector<8x8xf32> to vector<8x8xbf16>
    %44 = vector.extract_strided_slice %7 {offsets = [0, 0, 0], sizes = [1, 8, 32], strides = [1, 1, 1]} : vector<4x8x32xbf16> to vector<1x8x32xbf16>
    %45 = vector.shape_cast %44 : vector<1x8x32xbf16> to vector<8x32xbf16>
    %cst_29 = arith.constant dense<0.000000e+00> : vector<8x32xf32>
    %46 = tpu.matmul %43, %45, %cst_29 {dimension_numbers = #tpu.dot_dimension_numbers<[1], [0], [0], [1], [0, 0, 1, 1], [], []>} : vector<8x8xbf16>, vector<8x32xbf16>, vector<8x32xf32> -> vector<8x32xf32>
    %47 = arith.addf %23, %46 : vector<8x32xf32>
    %48 = vector.extract_strided_slice %16 {offsets = [0, 0, 8], sizes = [1, 8, 8], strides = [1, 1, 1]} : vector<1x8x32xbf16> to vector<1x8x8xbf16>
    %49 = vector.extract_strided_slice %19 {offsets = [0, 0, 8], sizes = [1, 8, 8], strides = [1, 1, 1]} : vector<1x8x32xbf16> to vector<1x8x8xbf16>
    %50 = vector.extract_strided_slice %22 {offsets = [0, 0, 8], sizes = [1, 8, 8], strides = [1, 1, 1]} : vector<1x8x32xbf16> to vector<1x8x8xbf16>
    "tpu.trace_start"() <{level = 10 : i32, message = "bqd,bkd->bqk"}> : () -> ()
    %cst_30 = arith.constant dense<0.000000e+00> : vector<1x8x8xf32>
    %51 = tpu.matmul %48, %49, %cst_30 {dimension_numbers = #tpu.dot_dimension_numbers<[2], [2], [1], [1], [0, 0, 0, 1, 1, 1], [0], [0]>} : vector<1x8x8xbf16>, vector<1x8x8xbf16>, vector<1x8x8xf32> -> vector<1x8x8xf32>
    "tpu.trace_stop"() : () -> ()
    %52 = vector.broadcast %8 : vector<1x1x8xf32> to vector<1x8x8xf32>
    %53 = arith.addf %51, %52 : vector<1x8x8xf32>
    %cst_31 = arith.constant dense<0xFF800000> : vector<1x8xf32>
    %54 = vector.multi_reduction <maximumf>, %53, %cst_31 [2] : vector<1x8x8xf32> to vector<1x8xf32>
    %55 = vector.shape_cast %54 : vector<1x8xf32> to vector<1x8x1xf32>
    %56 = vector.broadcast %55 : vector<1x8x1xf32> to vector<1x8x8xf32>
    %57 = arith.subf %53, %56 : vector<1x8x8xf32>
    %58 = math.exp %57 : vector<1x8x8xf32>
    %cst_32 = arith.constant dense<0.000000e+00> : vector<1x8xf32>
    %59 = vector.multi_reduction <add>, %58, %cst_32 [2] : vector<1x8x8xf32> to vector<1x8xf32>
    %60 = vector.shape_cast %59 : vector<1x8xf32> to vector<1x8x1xf32>
    %61 = tpu.reciprocal %60 {approx = true} : vector<1x8x1xf32> -> vector<1x8x1xf32>
    %62 = vector.broadcast %61 : vector<1x8x1xf32> to vector<1x8x8xf32>
    %63 = arith.mulf %58, %62 : vector<1x8x8xf32>
    %64 = arith.truncf %63 : vector<1x8x8xf32> to vector<1x8x8xbf16>
    "tpu.trace_start"() <{level = 10 : i32, message = "bqk,bkd->bqd"}> : () -> ()
    %cst_33 = arith.constant dense<0.000000e+00> : vector<1x8x8xf32>
    %65 = tpu.matmul %64, %50, %cst_33 {dimension_numbers = #tpu.dot_dimension_numbers<[2], [1], [1], [2], [0, 0, 0, 1, 1, 2], [0], [0]>} : vector<1x8x8xbf16>, vector<1x8x8xbf16>, vector<1x8x8xf32> -> vector<1x8x8xf32>
    "tpu.trace_stop"() : () -> ()
    %66 = vector.shape_cast %65 : vector<1x8x8xf32> to vector<8x8xf32>
    %67 = arith.truncf %66 : vector<8x8xf32> to vector<8x8xbf16>
    %68 = vector.extract_strided_slice %7 {offsets = [1, 0, 0], sizes = [1, 8, 32], strides = [1, 1, 1]} : vector<4x8x32xbf16> to vector<1x8x32xbf16>
    %69 = vector.shape_cast %68 : vector<1x8x32xbf16> to vector<8x32xbf16>
    %cst_34 = arith.constant dense<0.000000e+00> : vector<8x32xf32>
    %70 = tpu.matmul %67, %69, %cst_34 {dimension_numbers = #tpu.dot_dimension_numbers<[1], [0], [0], [1], [0, 0, 1, 1], [], []>} : vector<8x8xbf16>, vector<8x32xbf16>, vector<8x32xf32> -> vector<8x32xf32>
    %71 = arith.addf %47, %70 : vector<8x32xf32>
    %72 = vector.extract_strided_slice %16 {offsets = [0, 0, 16], sizes = [1, 8, 8], strides = [1, 1, 1]} : vector<1x8x32xbf16> to vector<1x8x8xbf16>
    %73 = vector.extract_strided_slice %19 {offsets = [0, 0, 16], sizes = [1, 8, 8], strides = [1, 1, 1]} : vector<1x8x32xbf16> to vector<1x8x8xbf16>
    %74 = vector.extract_strided_slice %22 {offsets = [0, 0, 16], sizes = [1, 8, 8], strides = [1, 1, 1]} : vector<1x8x32xbf16> to vector<1x8x8xbf16>
    "tpu.trace_start"() <{level = 10 : i32, message = "bqd,bkd->bqk"}> : () -> ()
    %cst_35 = arith.constant dense<0.000000e+00> : vector<1x8x8xf32>
    %75 = tpu.matmul %72, %73, %cst_35 {dimension_numbers = #tpu.dot_dimension_numbers<[2], [2], [1], [1], [0, 0, 0, 1, 1, 1], [0], [0]>} : vector<1x8x8xbf16>, vector<1x8x8xbf16>, vector<1x8x8xf32> -> vector<1x8x8xf32>
    "tpu.trace_stop"() : () -> ()
    %76 = vector.broadcast %8 : vector<1x1x8xf32> to vector<1x8x8xf32>
    %77 = arith.addf %75, %76 : vector<1x8x8xf32>
    %cst_36 = arith.constant dense<0xFF800000> : vector<1x8xf32>
    %78 = vector.multi_reduction <maximumf>, %77, %cst_36 [2] : vector<1x8x8xf32> to vector<1x8xf32>
    %79 = vector.shape_cast %78 : vector<1x8xf32> to vector<1x8x1xf32>
    %80 = vector.broadcast %79 : vector<1x8x1xf32> to vector<1x8x8xf32>
    %81 = arith.subf %77, %80 : vector<1x8x8xf32>
    %82 = math.exp %81 : vector<1x8x8xf32>
    %cst_37 = arith.constant dense<0.000000e+00> : vector<1x8xf32>
    %83 = vector.multi_reduction <add>, %82, %cst_37 [2] : vector<1x8x8xf32> to vector<1x8xf32>
    %84 = vector.shape_cast %83 : vector<1x8xf32> to vector<1x8x1xf32>
    %85 = tpu.reciprocal %84 {approx = true} : vector<1x8x1xf32> -> vector<1x8x1xf32>
    %86 = vector.broadcast %85 : vector<1x8x1xf32> to vector<1x8x8xf32>
    %87 = arith.mulf %82, %86 : vector<1x8x8xf32>
    %88 = arith.truncf %87 : vector<1x8x8xf32> to vector<1x8x8xbf16>
    "tpu.trace_start"() <{level = 10 : i32, message = "bqk,bkd->bqd"}> : () -> ()
    %cst_38 = arith.constant dense<0.000000e+00> : vector<1x8x8xf32>
    %89 = tpu.matmul %88, %74, %cst_38 {dimension_numbers = #tpu.dot_dimension_numbers<[2], [1], [1], [2], [0, 0, 0, 1, 1, 2], [0], [0]>} : vector<1x8x8xbf16>, vector<1x8x8xbf16>, vector<1x8x8xf32> -> vector<1x8x8xf32>
    "tpu.trace_stop"() : () -> ()
    %90 = vector.shape_cast %89 : vector<1x8x8xf32> to vector<8x8xf32>
    %91 = arith.truncf %90 : vector<8x8xf32> to vector<8x8xbf16>
    %92 = vector.extract_strided_slice %7 {offsets = [2, 0, 0], sizes = [1, 8, 32], strides = [1, 1, 1]} : vector<4x8x32xbf16> to vector<1x8x32xbf16>
    %93 = vector.shape_cast %92 : vector<1x8x32xbf16> to vector<8x32xbf16>
    %cst_39 = arith.constant dense<0.000000e+00> : vector<8x32xf32>
    %94 = tpu.matmul %91, %93, %cst_39 {dimension_numbers = #tpu.dot_dimension_numbers<[1], [0], [0], [1], [0, 0, 1, 1], [], []>} : vector<8x8xbf16>, vector<8x32xbf16>, vector<8x32xf32> -> vector<8x32xf32>
    %95 = arith.addf %71, %94 : vector<8x32xf32>
    %96 = vector.extract_strided_slice %16 {offsets = [0, 0, 24], sizes = [1, 8, 8], strides = [1, 1, 1]} : vector<1x8x32xbf16> to vector<1x8x8xbf16>
    %97 = vector.extract_strided_slice %19 {offsets = [0, 0, 24], sizes = [1, 8, 8], strides = [1, 1, 1]} : vector<1x8x32xbf16> to vector<1x8x8xbf16>
    %98 = vector.extract_strided_slice %22 {offsets = [0, 0, 24], sizes = [1, 8, 8], strides = [1, 1, 1]} : vector<1x8x32xbf16> to vector<1x8x8xbf16>
    "tpu.trace_start"() <{level = 10 : i32, message = "bqd,bkd->bqk"}> : () -> ()
    %cst_40 = arith.constant dense<0.000000e+00> : vector<1x8x8xf32>
    %99 = tpu.matmul %96, %97, %cst_40 {dimension_numbers = #tpu.dot_dimension_numbers<[2], [2], [1], [1], [0, 0, 0, 1, 1, 1], [0], [0]>} : vector<1x8x8xbf16>, vector<1x8x8xbf16>, vector<1x8x8xf32> -> vector<1x8x8xf32>
    "tpu.trace_stop"() : () -> ()
    %100 = vector.broadcast %8 : vector<1x1x8xf32> to vector<1x8x8xf32>
    %101 = arith.addf %99, %100 : vector<1x8x8xf32>
    %cst_41 = arith.constant dense<0xFF800000> : vector<1x8xf32>
    %102 = vector.multi_reduction <maximumf>, %101, %cst_41 [2] : vector<1x8x8xf32> to vector<1x8xf32>
    %103 = vector.shape_cast %102 : vector<1x8xf32> to vector<1x8x1xf32>
    %104 = vector.broadcast %103 : vector<1x8x1xf32> to vector<1x8x8xf32>
    %105 = arith.subf %101, %104 : vector<1x8x8xf32>
    %106 = math.exp %105 : vector<1x8x8xf32>
    %cst_42 = arith.constant dense<0.000000e+00> : vector<1x8xf32>
    %107 = vector.multi_reduction <add>, %106, %cst_42 [2] : vector<1x8x8xf32> to vector<1x8xf32>
    %108 = vector.shape_cast %107 : vector<1x8xf32> to vector<1x8x1xf32>
    %109 = tpu.reciprocal %108 {approx = true} : vector<1x8x1xf32> -> vector<1x8x1xf32>
    %110 = vector.broadcast %109 : vector<1x8x1xf32> to vector<1x8x8xf32>
    %111 = arith.mulf %106, %110 : vector<1x8x8xf32>
    %112 = arith.truncf %111 : vector<1x8x8xf32> to vector<1x8x8xbf16>
    "tpu.trace_start"() <{level = 10 : i32, message = "bqk,bkd->bqd"}> : () -> ()
    %cst_43 = arith.constant dense<0.000000e+00> : vector<1x8x8xf32>
    %113 = tpu.matmul %112, %98, %cst_43 {dimension_numbers = #tpu.dot_dimension_numbers<[2], [1], [1], [2], [0, 0, 0, 1, 1, 2], [0], [0]>} : vector<1x8x8xbf16>, vector<1x8x8xbf16>, vector<1x8x8xf32> -> vector<1x8x8xf32>
    "tpu.trace_stop"() : () -> ()
    %114 = vector.shape_cast %113 : vector<1x8x8xf32> to vector<8x8xf32>
    %115 = arith.truncf %114 : vector<8x8xf32> to vector<8x8xbf16>
    %116 = vector.extract_strided_slice %7 {offsets = [3, 0, 0], sizes = [1, 8, 32], strides = [1, 1, 1]} : vector<4x8x32xbf16> to vector<1x8x32xbf16>
    %117 = vector.shape_cast %116 : vector<1x8x32xbf16> to vector<8x32xbf16>
    %cst_44 = arith.constant dense<0.000000e+00> : vector<8x32xf32>
    %118 = tpu.matmul %115, %117, %cst_44 {dimension_numbers = #tpu.dot_dimension_numbers<[1], [0], [0], [1], [0, 0, 1, 1], [], []>} : vector<8x8xbf16>, vector<8x32xbf16>, vector<8x32xf32> -> vector<8x32xf32>
    %119 = arith.addf %95, %118 : vector<8x32xf32>
    %120 = vector.broadcast %0 : vector<1x32xf32> to vector<8x32xf32>
    %121 = arith.addf %119, %120 : vector<8x32xf32>
    %122 = arith.addf %121, %10 : vector<8x32xf32>
    %cst_45 = arith.constant dense<0.000000e+00> : vector<8xf32>
    %123 = vector.multi_reduction <add>, %122, %cst_45 [1] : vector<8x32xf32> to vector<8xf32>
    %124 = vector.shape_cast %123 : vector<8xf32> to vector<8x1xf32>
    %cst_46 = arith.constant 3.200000e+01 : f32
    %125 = vector.broadcast %cst_46 : f32 to vector<8x1xf32>
    %126 = arith.divf %124, %125 : vector<8x1xf32>
    %127 = vector.broadcast %126 : vector<8x1xf32> to vector<8x32xf32>
    %128 = arith.subf %122, %127 : vector<8x32xf32>
    %129 = arith.mulf %128, %128 : vector<8x32xf32>
    %cst_47 = arith.constant dense<0.000000e+00> : vector<8xf32>
    %130 = vector.multi_reduction <add>, %129, %cst_47 [1] : vector<8x32xf32> to vector<8xf32>
    %131 = vector.shape_cast %130 : vector<8xf32> to vector<8x1xf32>
    %cst_48 = arith.constant 3.200000e+01 : f32
    %132 = vector.broadcast %cst_48 : f32 to vector<8x1xf32>
    %133 = arith.divf %131, %132 : vector<8x1xf32>
    %134 = vector.broadcast %126 : vector<8x1xf32> to vector<8x32xf32>
    %135 = arith.subf %122, %134 : vector<8x32xf32>
    %cst_49 = arith.constant 9.99999974E-6 : f32
    %136 = vector.broadcast %cst_49 : f32 to vector<8x1xf32>
    %137 = arith.addf %133, %136 : vector<8x1xf32>
    %138 = math.rsqrt %137 : vector<8x1xf32>
    %139 = vector.broadcast %138 : vector<8x1xf32> to vector<8x32xf32>
    %140 = arith.mulf %135, %139 : vector<8x32xf32>
    %141 = vector.broadcast %1 : vector<1x32xf32> to vector<8x32xf32>
    %142 = arith.mulf %140, %141 : vector<8x32xf32>
    %143 = vector.broadcast %2 : vector<1x32xf32> to vector<8x32xf32>
    %144 = arith.addf %142, %143 : vector<8x32xf32>
    %145 = arith.truncf %144 : vector<8x32xf32> to vector<8x32xbf16>
    %c0_50 = arith.constant 0 : index
    %c0_51 = arith.constant 0 : index
    %146 = vector.load %arg8[%c0_50, %c0_51] : memref<32x128xbf16, #tpu.memory_space<vmem>>, vector<32x128xbf16>
    %cst_52 = arith.constant dense<0.000000e+00> : vector<8x128xf32>
    %147 = tpu.matmul %145, %146, %cst_52 {dimension_numbers = #tpu.dot_dimension_numbers<[1], [0], [0], [1], [0, 0, 1, 1], [], []>} : vector<8x32xbf16>, vector<32x128xbf16>, vector<8x128xf32> -> vector<8x128xf32>
    %148 = vector.broadcast %3 : vector<1x128xf32> to vector<8x128xf32>
    %149 = arith.addf %147, %148 : vector<8x128xf32>
    %cst_53 = arith.constant 0.000000e+00 : f32
    %150 = vector.broadcast %cst_53 : f32 to vector<8x128xf32>
    %151 = arith.maximumf %149, %150 : vector<8x128xf32>
    %152 = arith.truncf %151 : vector<8x128xf32> to vector<8x128xbf16>
    %c0_54 = arith.constant 0 : index
    %c0_55 = arith.constant 0 : index
    %153 = vector.load %arg10[%c0_54, %c0_55] : memref<128x32xbf16, #tpu.memory_space<vmem>>, vector<128x32xbf16>
    %cst_56 = arith.constant dense<0.000000e+00> : vector<8x32xf32>
    %154 = tpu.matmul %152, %153, %cst_56 {dimension_numbers = #tpu.dot_dimension_numbers<[1], [0], [0], [1], [0, 0, 1, 1], [], []>} : vector<8x128xbf16>, vector<128x32xbf16>, vector<8x32xf32> -> vector<8x32xf32>
    %155 = vector.broadcast %4 : vector<1x32xf32> to vector<8x32xf32>
    %156 = arith.addf %154, %155 : vector<8x32xf32>
    %157 = arith.addf %156, %144 : vector<8x32xf32>
    %cst_57 = arith.constant dense<0.000000e+00> : vector<8xf32>
    %158 = vector.multi_reduction <add>, %157, %cst_57 [1] : vector<8x32xf32> to vector<8xf32>
    %159 = vector.shape_cast %158 : vector<8xf32> to vector<8x1xf32>
    %cst_58 = arith.constant 3.200000e+01 : f32
    %160 = vector.broadcast %cst_58 : f32 to vector<8x1xf32>
    %161 = arith.divf %159, %160 : vector<8x1xf32>
    %162 = vector.broadcast %161 : vector<8x1xf32> to vector<8x32xf32>
    %163 = arith.subf %157, %162 : vector<8x32xf32>
    %164 = arith.mulf %163, %163 : vector<8x32xf32>
    %cst_59 = arith.constant dense<0.000000e+00> : vector<8xf32>
    %165 = vector.multi_reduction <add>, %164, %cst_59 [1] : vector<8x32xf32> to vector<8xf32>
    %166 = vector.shape_cast %165 : vector<8xf32> to vector<8x1xf32>
    %cst_60 = arith.constant 3.200000e+01 : f32
    %167 = vector.broadcast %cst_60 : f32 to vector<8x1xf32>
    %168 = arith.divf %166, %167 : vector<8x1xf32>
    %169 = vector.broadcast %161 : vector<8x1xf32> to vector<8x32xf32>
    %170 = arith.subf %157, %169 : vector<8x32xf32>
    %cst_61 = arith.constant 9.99999974E-6 : f32
    %171 = vector.broadcast %cst_61 : f32 to vector<8x1xf32>
    %172 = arith.addf %168, %171 : vector<8x1xf32>
    %173 = math.rsqrt %172 : vector<8x1xf32>
    %174 = vector.broadcast %173 : vector<8x1xf32> to vector<8x32xf32>
    %175 = arith.mulf %170, %174 : vector<8x32xf32>
    %176 = vector.broadcast %5 : vector<1x32xf32> to vector<8x32xf32>
    %177 = arith.mulf %175, %176 : vector<8x32xf32>
    %178 = vector.broadcast %6 : vector<1x32xf32> to vector<8x32xf32>
    %179 = arith.addf %177, %178 : vector<8x32xf32>
    %180 = vector.shape_cast %179 : vector<8x32xf32> to vector<1x8x32xf32>
    %c0_62 = arith.constant 0 : index
    %c0_63 = arith.constant 0 : index
    %c0_64 = arith.constant 0 : index
    %181 = vector.load %arg14[%c0_62, %c0_63, %c0_64] : memref<1x8x32xf32, #tpu.memory_space<vmem>>, vector<1x8x32xf32>
    tpu.vector_store %arg14[%c0_62, %c0_63, %c0_64], %180 {strides = array<i32>} : memref<1x8x32xf32, #tpu.memory_space<vmem>>, vector<1x8x32xf32>,
    return
  }
  func.func @transform_0(%arg0: i32) -> (i32, i32, i32) {
    %c0_i32 = arith.constant 0 : i32
    %c0_i32_0 = arith.constant 0 : i32
    %c0_i32_1 = arith.constant 0 : i32
    return %arg0, %c0_i32, %c0_i32_0 : i32, i32, i32
  }
  func.func @transform_1(%arg0: i32) -> (i32, i32, i32) {
    %c0_i32 = arith.constant 0 : i32
    %c0_i32_0 = arith.constant 0 : i32
    %c0_i32_1 = arith.constant 0 : i32
    return %arg0, %c0_i32, %c0_i32_0 : i32, i32, i32
  }
  func.func @transform_2(%arg0: i32) -> (i32, i32) {
    %c0_i32 = arith.constant 0 : i32
    %c0_i32_0 = arith.constant 0 : i32
    %c0_i32_1 = arith.constant 0 : i32
    return %c0_i32, %c0_i32_0 : i32, i32
  }
  func.func @transform_3(%arg0: i32) -> (i32, i32, i32) {
    %c0_i32 = arith.constant 0 : i32
    %c0_i32_0 = arith.constant 0 : i32
    %c0_i32_1 = arith.constant 0 : i32
    %c0_i32_2 = arith.constant 0 : i32
    return %c0_i32, %c0_i32_0, %c0_i32_1 : i32, i32, i32
  }
  func.func @transform_4(%arg0: i32) -> (i32, i32) {
    %c0_i32 = arith.constant 0 : i32
    %c0_i32_0 = arith.constant 0 : i32
    %c0_i32_1 = arith.constant 0 : i32
    return %c0_i32, %c0_i32_0 : i32, i32
  }
  func.func @transform_5(%arg0: i32) -> (i32, i32) {
    %c0_i32 = arith.constant 0 : i32
    %c0_i32_0 = arith.constant 0 : i32
    %c0_i32_1 = arith.constant 0 : i32
    return %c0_i32, %c0_i32_0 : i32, i32
  }
  func.func @transform_6(%arg0: i32) -> (i32, i32) {
    %c0_i32 = arith.constant 0 : i32
    %c0_i32_0 = arith.constant 0 : i32
    %c0_i32_1 = arith.constant 0 : i32
    return %c0_i32, %c0_i32_0 : i32, i32
  }
  func.func @transform_7(%arg0: i32) -> (i32, i32) {
    %c0_i32 = arith.constant 0 : i32
    %c0_i32_0 = arith.constant 0 : i32
    %c0_i32_1 = arith.constant 0 : i32
    return %c0_i32, %c0_i32_0 : i32, i32
  }
  func.func @transform_8(%arg0: i32) -> (i32, i32) {
    %c0_i32 = arith.constant 0 : i32
    %c0_i32_0 = arith.constant 0 : i32
    %c0_i32_1 = arith.constant 0 : i32
    return %c0_i32, %c0_i32_0 : i32, i32
  }
  func.func @transform_9(%arg0: i32) -> (i32, i32) {
    %c0_i32 = arith.constant 0 : i32
    %c0_i32_0 = arith.constant 0 : i32
    %c0_i32_1 = arith.constant 0 : i32
    return %c0_i32, %c0_i32_0 : i32, i32
  }
  func.func @transform_10(%arg0: i32) -> (i32, i32) {
    %c0_i32 = arith.constant 0 : i32
    %c0_i32_0 = arith.constant 0 : i32
    %c0_i32_1 = arith.constant 0 : i32
    return %c0_i32, %c0_i32_0 : i32, i32
  }
  func.func @transform_11(%arg0: i32) -> (i32, i32) {
    %c0_i32 = arith.constant 0 : i32
    %c0_i32_0 = arith.constant 0 : i32
    %c0_i32_1 = arith.constant 0 : i32
    return %c0_i32, %c0_i32_0 : i32, i32
  }
  func.func @transform_12(%arg0: i32) -> (i32, i32) {
    %c0_i32 = arith.constant 0 : i32
    %c0_i32_0 = arith.constant 0 : i32
    %c0_i32_1 = arith.constant 0 : i32
    return %c0_i32, %c0_i32_0 : i32, i32
  }
  func.func @transform_13(%arg0: i32) -> (i32, i32, i32) {
    %c0_i32 = arith.constant 0 : i32
    %c0_i32_0 = arith.constant 0 : i32
    %c0_i32_1 = arith.constant 0 : i32
    return %arg0, %c0_i32, %c0_i32_0 : i32, i32, i32
  }
}

module attributes {stable_mosaic.version = 11 : i64} {
  func.func @transformer_block_kernel(%arg0: i32, %arg1: memref<1x8x32xf32, #tpu.memory_space<vmem>>, %arg2: memref<1x1x8xf32, #tpu.memory_space<vmem>>, %arg3: memref<32x96xbf16, #tpu.memory_space<vmem>>, %arg4: memref<4x8x32xbf16, #tpu.memory_space<vmem>>, %arg5: memref<1x32xf32, #tpu.memory_space<vmem>>, %arg6: memref<1x32xf32, #tpu.memory_space<vmem>>, %arg7: memref<1x32xf32, #tpu.memory_space<vmem>>, %arg8: memref<32x128xbf16, #tpu.memory_space<vmem>>, %arg9: memref<1x128xf32, #tpu.memory_space<vmem>>, %arg10: memref<128x32xbf16, #tpu.memory_space<vmem>>, %arg11: memref<1x32xf32, #tpu.memory_space<vmem>>, %arg12: memref<1x32xf32, #tpu.memory_space<vmem>>, %arg13: memref<1x32xf32, #tpu.memory_space<vmem>>, %arg14: memref<1x8x32xf32, #tpu.memory_space<vmem>>) attributes {dimension_semantics = [#tpu.dimension_semantics<parallel>], iteration_bounds = array<i64: 2>, scalar_prefetch = 0 : i64, scratch_operands = 0 : i64, tpu.core_type = #tpu.core_type<tc>, window_params = [{transform_indices = @transform_0, window_bounds = array<i64: 1, 8, 32>}, {transform_indices = @transform_1, window_bounds = array<i64: 1, 1, 8>}, {pipeline_mode = #tpu.pipeline_mode<synchronous>, transform_indices = @transform_2, window_bounds = array<i64: 32, 96>}, {pipeline_mode = #tpu.pipeline_mode<synchronous>, transform_indices = @transform_3, window_bounds = array<i64: 4, 8, 32>}, {pipeline_mode = #tpu.pipeline_mode<synchronous>, transform_indices = @transform_4, window_bounds = array<i64: 1, 32>}, {pipeline_mode = #tpu.pipeline_mode<synchronous>, transform_indices = @transform_5, window_bounds = array<i64: 1, 32>}, {pipeline_mode = #tpu.pipeline_mode<synchronous>, transform_indices = @transform_6, window_bounds = array<i64: 1, 32>}, {pipeline_mode = #tpu.pipeline_mode<synchronous>, transform_indices = @transform_7, window_bounds = array<i64: 32, 128>}, {pipeline_mode = #tpu.pipeline_mode<synchronous>, transform_indices = @transform_8, window_bounds = array<i64: 1, 128>}, {pipeline_mode = #tpu.pipeline_mode<synchronous>, transform_indices = @transform_9, window_bounds = array<i64: 128, 32>}, {pipeline_mode = #tpu.pipeline_mode<synchronous>, transform_indices = @transform_10, window_bounds = array<i64: 1, 32>}, {pipeline_mode = #tpu.pipeline_mode<synchronous>, transform_indices = @transform_11, window_bounds = array<i64: 1, 32>}, {pipeline_mode = #tpu.pipeline_mode<synchronous>, transform_indices = @transform_12, window_bounds = array<i64: 1, 32>}, {transform_indices = @transform_13, window_bounds = array<i64: 1, 8, 32>}]} {
    %c0 = arith.constant 0 : index
    %c0_0 = arith.constant 0 : index
    %0 = vector.load %arg5[%c0, %c0_0] : memref<1x32xf32, #tpu.memory_space<vmem>>, vector<1x32xf32>
    %c0_1 = arith.constant 0 : index
    %c0_2 = arith.constant 0 : index
    %1 = vector.load %arg6[%c0_1, %c0_2] : memref<1x32xf32, #tpu.memory_space<vmem>>, vector<1x32xf32>
    %c0_3 = arith.constant 0 : index
    %c0_4 = arith.constant 0 : index
    %2 = vector.load %arg7[%c0_3, %c0_4] : memref<1x32xf32, #tpu.memory_space<vmem>>, vector<1x32xf32>
    %c0_5 = arith.constant 0 : index
    %c0_6 = arith.constant 0 : index
    %3 = vector.load %arg9[%c0_5, %c0_6] : memref<1x128xf32, #tpu.memory_space<vmem>>, vector<1x128xf32>
    %c0_7 = arith.constant 0 : index
    %c0_8 = arith.constant 0 : index
    %4 = vector.load %arg11[%c0_7, %c0_8] : memref<1x32xf32, #tpu.memory_space<vmem>>, vector<1x32xf32>
    %c0_9 = arith.constant 0 : index
    %c0_10 = arith.constant 0 : index
    %5 = vector.load %arg12[%c0_9, %c0_10] : memref<1x32xf32, #tpu.memory_space<vmem>>, vector<1x32xf32>
    %c0_11 = arith.constant 0 : index
    %c0_12 = arith.constant 0 : index
    %6 = vector.load %arg13[%c0_11, %c0_12] : memref<1x32xf32, #tpu.memory_space<vmem>>, vector<1x32xf32>
    %c0_13 = arith.constant 0 : index
    %c0_14 = arith.constant 0 : index
    %c0_15 = arith.constant 0 : index
    %7 = vector.load %arg4[%c0_13, %c0_14, %c0_15] : memref<4x8x32xbf16, #tpu.memory_space<vmem>>, vector<4x8x32xbf16>
    %c0_16 = arith.constant 0 : index
    %c0_17 = arith.constant 0 : index
    %c0_18 = arith.constant 0 : index
    %8 = vector.load %arg2[%c0_16, %c0_17, %c0_18] : memref<1x1x8xf32, #tpu.memory_space<vmem>>, vector<1x1x8xf32>
    %c0_19 = arith.constant 0 : index
    %c0_20 = arith.constant 0 : index
    %c0_21 = arith.constant 0 : index
    %9 = vector.load %arg1[%c0_19, %c0_20, %c0_21] : memref<1x8x32xf32, #tpu.memory_space<vmem>>, vector<1x8x32xf32>
    %10 = vector.shape_cast %9 : vector<1x8x32xf32> to vector<8x32xf32>
    %11 = arith.truncf %10 : vector<8x32xf32> to vector<8x32xbf16>
    %c0_22 = arith.constant 0 : index
    %c0_23 = arith.constant 0 : index
    %12 = vector.load %arg3[%c0_22, %c0_23] : memref<32x96xbf16, #tpu.memory_space<vmem>>, vector<32x96xbf16>
    %cst = arith.constant dense<0.000000e+00> : vector<8x96xf32>
    %13 = tpu.matmul %11, %12, %cst {dimension_numbers = #tpu.dot_dimension_numbers<[1], [0], [0], [1], [0, 0, 1, 1], [], []>} : vector<8x32xbf16>, vector<32x96xbf16>, vector<8x96xf32> -> vector<8x96xf32>
    %14 = vector.extract_strided_slice %13 {offsets = [0, 0], sizes = [8, 32], strides = [1, 1]} : vector<8x96xf32> to vector<8x32xf32>
    %15 = vector.shape_cast %14 : vector<8x32xf32> to vector<1x8x32xf32>
    %16 = arith.truncf %15 : vector<1x8x32xf32> to vector<1x8x32xbf16>
    %17 = vector.extract_strided_slice %13 {offsets = [0, 32], sizes = [8, 32], strides = [1, 1]} : vector<8x96xf32> to vector<8x32xf32>
    %18 = vector.shape_cast %17 : vector<8x32xf32> to vector<1x8x32xf32>
    %19 = arith.truncf %18 : vector<1x8x32xf32> to vector<1x8x32xbf16>
    %20 = vector.extract_strided_slice %13 {offsets = [0, 64], sizes = [8, 32], strides = [1, 1]} : vector<8x96xf32> to vector<8x32xf32>
    %21 = vector.shape_cast %20 : vector<8x32xf32> to vector<1x8x32xf32>
    %22 = arith.truncf %21 : vector<1x8x32xf32> to vector<1x8x32xbf16>
    %cst_24 = arith.constant 0.000000e+00 : f32
    %23 = vector.broadcast %cst_24 : f32 to vector<8x32xf32>
    %24 = vector.extract_strided_slice %16 {offsets = [0, 0, 0], sizes = [1, 8, 8], strides = [1, 1, 1]} : vector<1x8x32xbf16> to vector<1x8x8xbf16>
    %25 = vector.extract_strided_slice %19 {offsets = [0, 0, 0], sizes = [1, 8, 8], strides = [1, 1, 1]} : vector<1x8x32xbf16> to vector<1x8x8xbf16>
    %26 = vector.extract_strided_slice %22 {offsets = [0, 0, 0], sizes = [1, 8, 8], strides = [1, 1, 1]} : vector<1x8x32xbf16> to vector<1x8x8xbf16>
    "tpu.trace_start"() <{level = 10 : i32, message = "bqd,bkd->bqk"}> : () -> ()
    %cst_25 = arith.constant dense<0.000000e+00> : vector<1x8x8xf32>
    %27 = tpu.matmul %24, %25, %cst_25 {dimension_numbers = #tpu.dot_dimension_numbers<[2], [2], [1], [1], [0, 0, 0, 1, 1, 1], [0], [0]>} : vector<1x8x8xbf16>, vector<1x8x8xbf16>, vector<1x8x8xf32> -> vector<1x8x8xf32>
    "tpu.trace_stop"() : () -> ()
    %28 = vector.broadcast %8 : vector<1x1x8xf32> to vector<1x8x8xf32>
    %29 = arith.addf %27, %28 : vector<1x8x8xf32>
    %cst_26 = arith.constant dense<0xFF800000> : vector<1x8xf32>
    %30 = vector.multi_reduction <maximumf>, %29, %cst_26 [2] : vector<1x8x8xf32> to vector<1x8xf32>
    %31 = vector.shape_cast %30 : vector<1x8xf32> to vector<1x8x1xf32>
    %32 = vector.broadcast %31 : vector<1x8x1xf32> to vector<1x8x8xf32>
    %33 = arith.subf %29, %32 : vector<1x8x8xf32>
    %34 = math.exp %33 : vector<1x8x8xf32>
    %cst_27 = arith.constant dense<0.000000e+00> : vector<1x8xf32>
    %35 = vector.multi_reduction <add>, %34, %cst_27 [2] : vector<1x8x8xf32> to vector<1x8xf32>
    %36 = vector.shape_cast %35 : vector<1x8xf32> to vector<1x8x1xf32>
    %37 = tpu.reciprocal %36 {approx = true} : vector<1x8x1xf32> -> vector<1x8x1xf32>
    %38 = vector.broadcast %37 : vector<1x8x1xf32> to vector<1x8x8xf32>
    %39 = arith.mulf %34, %38 : vector<1x8x8xf32>
    %40 = arith.truncf %39 : vector<1x8x8xf32> to vector<1x8x8xbf16>
    "tpu.trace_start"() <{level = 10 : i32, message = "bqk,bkd->bqd"}> : () -> ()
    %cst_28 = arith.constant dense<0.000000e+00> : vector<1x8x8xf32>
    %41 = tpu.matmul %40, %26, %cst_28 {dimension_numbers = #tpu.dot_dimension_numbers<[2], [1], [1], [2], [0, 0, 0, 1, 1, 2], [0], [0]>} : vector<1x8x8xbf16>, vector<1x8x8xbf16>, vector<1x8x8xf32> -> vector<1x8x8xf32>
    "tpu.trace_stop"() : () -> ()
    %42 = vector.shape_cast %41 : vector<1x8x8xf32> to vector<8x8xf32>
    %43 = arith.truncf %42 : vector<8x8xf32> to vector<8x8xbf16>
    %44 = vector.extract_strided_slice %7 {offsets = [0, 0, 0], sizes = [1, 8, 32], strides = [1, 1, 1]} : vector<4x8x32xbf16> to vector<1x8x32xbf16>
    %45 = vector.shape_cast %44 : vector<1x8x32xbf16> to vector<8x32xbf16>
    %cst_29 = arith.constant dense<0.000000e+00> : vector<8x32xf32>
    %46 = tpu.matmul %43, %45, %cst_29 {dimension_numbers = #tpu.dot_dimension_numbers<[1], [0], [0], [1], [0, 0, 1, 1], [], []>} : vector<8x8xbf16>, vector<8x32xbf16>, vector<8x32xf32> -> vector<8x32xf32>
    %47 = arith.addf %23, %46 : vector<8x32xf32>
    %48 = vector.extract_strided_slice %16 {offsets = [0, 0, 8], sizes = [1, 8, 8], strides = [1, 1, 1]} : vector<1x8x32xbf16> to vector<1x8x8xbf16>
    %49 = vector.extract_strided_slice %19 {offsets = [0, 0, 8], sizes = [1, 8, 8], strides = [1, 1, 1]} : vector<1x8x32xbf16> to vector<1x8x8xbf16>
    %50 = vector.extract_strided_slice %22 {offsets = [0, 0, 8], sizes = [1, 8, 8], strides = [1, 1, 1]} : vector<1x8x32xbf16> to vector<1x8x8xbf16>
    "tpu.trace_start"() <{level = 10 : i32, message = "bqd,bkd->bqk"}> : () -> ()
    %cst_30 = arith.constant dense<0.000000e+00> : vector<1x8x8xf32>
    %51 = tpu.matmul %48, %49, %cst_30 {dimension_numbers = #tpu.dot_dimension_numbers<[2], [2], [1], [1], [0, 0, 0, 1, 1, 1], [0], [0]>} : vector<1x8x8xbf16>, vector<1x8x8xbf16>, vector<1x8x8xf32> -> vector<1x8x8xf32>
    "tpu.trace_stop"() : () -> ()
    %52 = vector.broadcast %8 : vector<1x1x8xf32> to vector<1x8x8xf32>
    %53 = arith.addf %51, %52 : vector<1x8x8xf32>
    %cst_31 = arith.constant dense<0xFF800000> : vector<1x8xf32>
    %54 = vector.multi_reduction <maximumf>, %53, %cst_31 [2] : vector<1x8x8xf32> to vector<1x8xf32>
    %55 = vector.shape_cast %54 : vector<1x8xf32> to vector<1x8x1xf32>
    %56 = vector.broadcast %55 : vector<1x8x1xf32> to vector<1x8x8xf32>
    %57 = arith.subf %53, %56 : vector<1x8x8xf32>
    %58 = math.exp %57 : vector<1x8x8xf32>
    %cst_32 = arith.constant dense<0.000000e+00> : vector<1x8xf32>
    %59 = vector.multi_reduction <add>, %58, %cst_32 [2] : vector<1x8x8xf32> to vector<1x8xf32>
    %60 = vector.shape_cast %59 : vector<1x8xf32> to vector<1x8x1xf32>
    %61 = tpu.reciprocal %60 {approx = true} : vector<1x8x1xf32> -> vector<1x8x1xf32>
    %62 = vector.broadcast %61 : vector<1x8x1xf32> to vector<1x8x8xf32>
    %63 = arith.mulf %58, %62 : vector<1x8x8xf32>
    %64 = arith.truncf %63 : vector<1x8x8xf32> to vector<1x8x8xbf16>
    "tpu.trace_start"() <{level = 10 : i32, message = "bqk,bkd->bqd"}> : () -> ()
    %cst_33 = arith.constant dense<0.000000e+00> : vector<1x8x8xf32>
    %65 = tpu.matmul %64, %50, %cst_33 {dimension_numbers = #tpu.dot_dimension_numbers<[2], [1], [1], [2], [0, 0, 0, 1, 1, 2], [0], [0]>} : vector<1x8x8xbf16>, vector<1x8x8xbf16>, vector<1x8x8xf32> -> vector<1x8x8xf32>
    "tpu.trace_stop"() : () -> ()
    %66 = vector.shape_cast %65 : vector<1x8x8xf32> to vector<8x8xf32>
    %67 = arith.truncf %66 : vector<8x8xf32> to vector<8x8xbf16>
    %68 = vector.extract_strided_slice %7 {offsets = [1, 0, 0], sizes = [1, 8, 32], strides = [1, 1, 1]} : vector<4x8x32xbf16> to vector<1x8x32xbf16>
    %69 = vector.shape_cast %68 : vector<1x8x32xbf16> to vector<8x32xbf16>
    %cst_34 = arith.constant dense<0.000000e+00> : vector<8x32xf32>
    %70 = tpu.matmul %67, %69, %cst_34 {dimension_numbers = #tpu.dot_dimension_numbers<[1], [0], [0], [1], [0, 0, 1, 1], [], []>} : vector<8x8xbf16>, vector<8x32xbf16>, vector<8x32xf32> -> vector<8x32xf32>
    %71 = arith.addf %47, %70 : vector<8x32xf32>
    %72 = vector.extract_strided_slice %16 {offsets = [0, 0, 16], sizes = [1, 8, 8], strides = [1, 1, 1]} : vector<1x8x32xbf16> to vector<1x8x8xbf16>
    %73 = vector.extract_strided_slice %19 {offsets = [0, 0, 16], sizes = [1, 8, 8], strides = [1, 1, 1]} : vector<1x8x32xbf16> to vector<1x8x8xbf16>
    %74 = vector.extract_strided_slice %22 {offsets = [0, 0, 16], sizes = [1, 8, 8], strides = [1, 1, 1]} : vector<1x8x32xbf16> to vector<1x8x8xbf16>
    "tpu.trace_start"() <{level = 10 : i32, message = "bqd,bkd->bqk"}> : () -> ()
    %cst_35 = arith.constant dense<0.000000e+00> : vector<1x8x8xf32>
    %75 = tpu.matmul %72, %73, %cst_35 {dimension_numbers = #tpu.dot_dimension_numbers<[2], [2], [1], [1], [0, 0, 0, 1, 1, 1], [0], [0]>} : vector<1x8x8xbf16>, vector<1x8x8xbf16>, vector<1x8x8xf32> -> vector<1x8x8xf32>
    "tpu.trace_stop"() : () -> ()
    %76 = vector.broadcast %8 : vector<1x1x8xf32> to vector<1x8x8xf32>
    %77 = arith.addf %75, %76 : vector<1x8x8xf32>
    %cst_36 = arith.constant dense<0xFF800000> : vector<1x8xf32>
    %78 = vector.multi_reduction <maximumf>, %77, %cst_36 [2] : vector<1x8x8xf32> to vector<1x8xf32>
    %79 = vector.shape_cast %78 : vector<1x8xf32> to vector<1x8x1xf32>
    %80 = vector.broadcast %79 : vector<1x8x1xf32> to vector<1x8x8xf32>
    %81 = arith.subf %77, %80 : vector<1x8x8xf32>
    %82 = math.exp %81 : vector<1x8x8xf32>
    %cst_37 = arith.constant dense<0.000000e+00> : vector<1x8xf32>
    %83 = vector.multi_reduction <add>, %82, %cst_37 [2] : vector<1x8x8xf32> to vector<1x8xf32>
    %84 = vector.shape_cast %83 : vector<1x8xf32> to vector<1x8x1xf32>
    %85 = tpu.reciprocal %84 {approx = true} : vector<1x8x1xf32> -> vector<1x8x1xf32>
    %86 = vector.broadcast %85 : vector<1x8x1xf32> to vector<1x8x8xf32>
    %87 = arith.mulf %82, %86 : vector<1x8x8xf32>
    %88 = arith.truncf %87 : vector<1x8x8xf32> to vector<1x8x8xbf16>
    "tpu.trace_start"() <{level = 10 : i32, message = "bqk,bkd->bqd"}> : () -> ()
    %cst_38 = arith.constant dense<0.000000e+00> : vector<1x8x8xf32>
    %89 = tpu.matmul %88, %74, %cst_38 {dimension_numbers = #tpu.dot_dimension_numbers<[2], [1], [1], [2], [0, 0, 0, 1, 1, 2], [0], [0]>} : vector<1x8x8xbf16>, vector<1x8x8xbf16>, vector<1x8x8xf32> -> vector<1x8x8xf32>
    "tpu.trace_stop"() : () -> ()
    %90 = vector.shape_cast %89 : vector<1x8x8xf32> to vector<8x8xf32>
    %91 = arith.truncf %90 : vector<8x8xf32> to vector<8x8xbf16>
    %92 = vector.extract_strided_slice %7 {offsets = [2, 0, 0], sizes = [1, 8, 32], strides = [1, 1, 1]} : vector<4x8x32xbf16> to vector<1x8x32xbf16>
    %93 = vector.shape_cast %92 : vector<1x8x32xbf16> to vector<8x32xbf16>
    %cst_39 = arith.constant dense<0.000000e+00> : vector<8x32xf32>
    %94 = tpu.matmul %91, %93, %cst_39 {dimension_numbers = #tpu.dot_dimension_numbers<[1], [0], [0], [1], [0, 0, 1, 1], [], []>} : vector<8x8xbf16>, vector<8x32xbf16>, vector<8x32xf32> -> vector<8x32xf32>
    %95 = arith.addf %71, %94 : vector<8x32xf32>
    %96 = vector.extract_strided_slice %16 {offsets = [0, 0, 24], sizes = [1, 8, 8], strides = [1, 1, 1]} : vector<1x8x32xbf16> to vector<1x8x8xbf16>
    %97 = vector.extract_strided_slice %19 {offsets = [0, 0, 24], sizes = [1, 8, 8], strides = [1, 1, 1]} : vector<1x8x32xbf16> to vector<1x8x8xbf16>
    %98 = vector.extract_strided_slice %22 {offsets = [0, 0, 24], sizes = [1, 8, 8], strides = [1, 1, 1]} : vector<1x8x32xbf16> to vector<1x8x8xbf16>
    "tpu.trace_start"() <{level = 10 : i32, message = "bqd,bkd->bqk"}> : () -> ()
    %cst_40 = arith.constant dense<0.000000e+00> : vector<1x8x8xf32>
    %99 = tpu.matmul %96, %97, %cst_40 {dimension_numbers = #tpu.dot_dimension_numbers<[2], [2], [1], [1], [0, 0, 0, 1, 1, 1], [0], [0]>} : vector<1x8x8xbf16>, vector<1x8x8xbf16>, vector<1x8x8xf32> -> vector<1x8x8xf32>
    "tpu.trace_stop"() : () -> ()
    %100 = vector.broadcast %8 : vector<1x1x8xf32> to vector<1x8x8xf32>
    %101 = arith.addf %99, %100 : vector<1x8x8xf32>
    %cst_41 = arith.constant dense<0xFF800000> : vector<1x8xf32>
    %102 = vector.multi_reduction <maximumf>, %101, %cst_41 [2] : vector<1x8x8xf32> to vector<1x8xf32>
    %103 = vector.shape_cast %102 : vector<1x8xf32> to vector<1x8x1xf32>
    %104 = vector.broadcast %103 : vector<1x8x1xf32> to vector<1x8x8xf32>
    %105 = arith.subf %101, %104 : vector<1x8x8xf32>
    %106 = math.exp %105 : vector<1x8x8xf32>
    %cst_42 = arith.constant dense<0.000000e+00> : vector<1x8xf32>
    %107 = vector.multi_reduction <add>, %106, %cst_42 [2] : vector<1x8x8xf32> to vector<1x8xf32>
    %108 = vector.shape_cast %107 : vector<1x8xf32> to vector<1x8x1xf32>
    %109 = tpu.reciprocal %108 {approx = true} : vector<1x8x1xf32> -> vector<1x8x1xf32>
    %110 = vector.broadcast %109 : vector<1x8x1xf32> to vector<1x8x8xf32>
    %111 = arith.mulf %106, %110 : vector<1x8x8xf32>
    %112 = arith.truncf %111 : vector<1x8x8xf32> to vector<1x8x8xbf16>
    "tpu.trace_start"() <{level = 10 : i32, message = "bqk,bkd->bqd"}> : () -> ()
    %cst_43 = arith.constant dense<0.000000e+00> : vector<1x8x8xf32>
    %113 = tpu.matmul %112, %98, %cst_43 {dimension_numbers = #tpu.dot_dimension_numbers<[2], [1], [1], [2], [0, 0, 0, 1, 1, 2], [0], [0]>} : vector<1x8x8xbf16>, vector<1x8x8xbf16>, vector<1x8x8xf32> -> vector<1x8x8xf32>
    "tpu.trace_stop"() : () -> ()
    %114 = vector.shape_cast %113 : vector<1x8x8xf32> to vector<8x8xf32>
    %115 = arith.truncf %114 : vector<8x8xf32> to vector<8x8xbf16>
    %116 = vector.extract_strided_slice %7 {offsets = [3, 0, 0], sizes = [1, 8, 32], strides = [1, 1, 1]} : vector<4x8x32xbf16> to vector<1x8x32xbf16>
    %117 = vector.shape_cast %116 : vector<1x8x32xbf16> to vector<8x32xbf16>
    %cst_44 = arith.constant dense<0.000000e+00> : vector<8x32xf32>
    %118 = tpu.matmul %115, %117, %cst_44 {dimension_numbers = #tpu.dot_dimension_numbers<[1], [0], [0], [1], [0, 0, 1, 1], [], []>} : vector<8x8xbf16>, vector<8x32xbf16>, vector<8x32xf32> -> vector<8x32xf32>
    %119 = arith.addf %95, %118 : vector<8x32xf32>
    %120 = vector.broadcast %0 : vector<1x32xf32> to vector<8x32xf32>
    %121 = arith.addf %119, %120 : vector<8x32xf32>
    %122 = arith.addf %121, %10 : vector<8x32xf32>
    %cst_45 = arith.constant dense<0.000000e+00> : vector<8xf32>
    %123 = vector.multi_reduction <add>, %122, %cst_45 [1] : vector<8x32xf32> to vector<8xf32>
    %124 = vector.shape_cast %123 : vector<8xf32> to vector<8x1xf32>
    %cst_46 = arith.constant 3.200000e+01 : f32
    %125 = vector.broadcast %cst_46 : f32 to vector<8x1xf32>
    %126 = arith.divf %124, %125 : vector<8x1xf32>
    %127 = vector.broadcast %126 : vector<8x1xf32> to vector<8x32xf32>
    %128 = arith.subf %122, %127 : vector<8x32xf32>
    %129 = arith.mulf %128, %128 : vector<8x32xf32>
    %cst_47 = arith.constant dense<0.000000e+00> : vector<8xf32>
    %130 = vector.multi_reduction <add>, %129, %cst_47 [1] : vector<8x32xf32> to vector<8xf32>
    %131 = vector.shape_cast %130 : vector<8xf32> to vector<8x1xf32>
    %cst_48 = arith.constant 3.200000e+01 : f32
    %132 = vector.broadcast %cst_48 : f32 to vector<8x1xf32>
    %133 = arith.divf %131, %132 : vector<8x1xf32>
    %134 = vector.broadcast %126 : vector<8x1xf32> to vector<8x32xf32>
    %135 = arith.subf %122, %134 : vector<8x32xf32>
    %cst_49 = arith.constant 9.99999974E-6 : f32
    %136 = vector.broadcast %cst_49 : f32 to vector<8x1xf32>
    %137 = arith.addf %133, %136 : vector<8x1xf32>
    %138 = math.rsqrt %137 : vector<8x1xf32>
    %139 = vector.broadcast %138 : vector<8x1xf32> to vector<8x32xf32>
    %140 = arith.mulf %135, %139 : vector<8x32xf32>
    %141 = vector.broadcast %1 : vector<1x32xf32> to vector<8x32xf32>
    %142 = arith.mulf %140, %141 : vector<8x32xf32>
    %143 = vector.broadcast %2 : vector<1x32xf32> to vector<8x32xf32>
    %144 = arith.addf %142, %143 : vector<8x32xf32>
    %145 = arith.truncf %144 : vector<8x32xf32> to vector<8x32xbf16>
    %c0_50 = arith.constant 0 : index
    %c0_51 = arith.constant 0 : index
    %146 = vector.load %arg8[%c0_50, %c0_51] : memref<32x128xbf16, #tpu.memory_space<vmem>>, vector<32x128xbf16>
    %cst_52 = arith.constant dense<0.000000e+00> : vector<8x128xf32>
    %147 = tpu.matmul %145, %146, %cst_52 {dimension_numbers = #tpu.dot_dimension_numbers<[1], [0], [0], [1], [0, 0, 1, 1], [], []>} : vector<8x32xbf16>, vector<32x128xbf16>, vector<8x128xf32> -> vector<8x128xf32>
    %148 = vector.broadcast %3 : vector<1x128xf32> to vector<8x128xf32>
    %149 = arith.addf %147, %148 : vector<8x128xf32>
    %cst_53 = arith.constant 0.000000e+00 : f32
    %150 = vector.broadcast %cst_53 : f32 to vector<8x128xf32>
    %151 = arith.maximumf %149, %150 : vector<8x128xf32>
    %152 = arith.truncf %151 : vector<8x128xf32> to vector<8x128xbf16>
    %c0_54 = arith.constant 0 : index
    %c0_55 = arith.constant 0 : index
    %153 = vector.load %arg10[%c0_54, %c0_55] : memref<128x32xbf16, #tpu.memory_space<vmem>>, vector<128x32xbf16>
    %cst_56 = arith.constant dense<0.000000e+00> : vector<8x32xf32>
    %154 = tpu.matmul %152, %153, %cst_56 {dimension_numbers = #tpu.dot_dimension_numbers<[1], [0], [0], [1], [0, 0, 1, 1], [], []>} : vector<8x128xbf16>, vector<128x32xbf16>, vector<8x32xf32> -> vector<8x32xf32>
    %155 = vector.broadcast %4 : vector<1x32xf32> to vector<8x32xf32>
    %156 = arith.addf %154, %155 : vector<8x32xf32>
    %157 = arith.addf %156, %144 : vector<8x32xf32>
    %cst_57 = arith.constant dense<0.000000e+00> : vector<8xf32>
    %158 = vector.multi_reduction <add>, %157, %cst_57 [1] : vector<8x32xf32> to vector<8xf32>
    %159 = vector.shape_cast %158 : vector<8xf32> to vector<8x1xf32>
    %cst_58 = arith.constant 3.200000e+01 : f32
    %160 = vector.broadcast %cst_58 : f32 to vector<8x1xf32>
    %161 = arith.divf %159, %160 : vector<8x1xf32>
    %162 = vector.broadcast %161 : vector<8x1xf32> to vector<8x32xf32>
    %163 = arith.subf %157, %162 : vector<8x32xf32>
    %164 = arith.mulf %163, %163 : vector<8x32xf32>
    %cst_59 = arith.constant dense<0.000000e+00> : vector<8xf32>
    %165 = vector.multi_reduction <add>, %164, %cst_59 [1] : vector<8x32xf32> to vector<8xf32>
    %166 = vector.shape_cast %165 : vector<8xf32> to vector<8x1xf32>
    %cst_60 = arith.constant 3.200000e+01 : f32
    %167 = vector.broadcast %cst_60 : f32 to vector<8x1xf32>
    %168 = arith.divf %166, %167 : vector<8x1xf32>
    %169 = vector.broadcast %161 : vector<8x1xf32> to vector<8x32xf32>
    %170 = arith.subf %157, %169 : vector<8x32xf32>
    %cst_61 = arith.constant 9.99999974E-6 : f32
    %171 = vector.broadcast %cst_61 : f32 to vector<8x1xf32>
    %172 = arith.addf %168, %171 : vector<8x1xf32>
    %173 = math.rsqrt %172 : vector<8x1xf32>
    %174 = vector.broadcast %173 : vector<8x1xf32> to vector<8x32xf32>
    %175 = arith.mulf %170, %174 : vector<8x32xf32>
    %176 = vector.broadcast %5 : vector<1x32xf32> to vector<8x32xf32>
    %177 = arith.mulf %175, %176 : vector<8x32xf32>
    %178 = vector.broadcast %6 : vector<1x32xf32> to vector<8x32xf32>
    %179 = arith.addf %177, %178 : vector<8x32xf32>
    %180 = vector.shape_cast %179 : vector<8x32xf32> to vector<1x8x32xf32>
    %c0_62 = arith.constant 0 : index
    %c0_63 = arith.constant 0 : index
    %c0_64 = arith.constant 0 : index
    %181 = vector.load %arg14[%c0_62, %c0_63, %c0_64] : memref<1x8x32xf32, #tpu.memory_space<vmem>>, vector<1x8x32xf32>
    tpu.vector_store %arg14[%c0_62, %c0_63, %c0_64], %180 {strides = array<i32>} : memref<1x8x32xf32, #tpu.memory_space<vmem>>, vector<1x8x32xf32>,
    return
  }
  func.func @transform_0(%arg0: i32) -> (i32, i32, i32) {
    %c0_i32 = arith.constant 0 : i32
    %c0_i32_0 = arith.constant 0 : i32
    %c0_i32_1 = arith.constant 0 : i32
    return %arg0, %c0_i32, %c0_i32_0 : i32, i32, i32
  }
  func.func @transform_1(%arg0: i32) -> (i32, i32, i32) {
    %c0_i32 = arith.constant 0 : i32
    %c0_i32_0 = arith.constant 0 : i32
    %c0_i32_1 = arith.constant 0 : i32
    return %arg0, %c0_i32, %c0_i32_0 : i32, i32, i32
  }
  func.func @transform_2(%arg0: i32) -> (i32, i32) {
    %c0_i32 = arith.constant 0 : i32
    %c0_i32_0 = arith.constant 0 : i32
    %c0_i32_1 = arith.constant 0 : i32
    return %c0_i32, %c0_i32_0 : i32, i32
  }
  func.func @transform_3(%arg0: i32) -> (i32, i32, i32) {
    %c0_i32 = arith.constant 0 : i32
    %c0_i32_0 = arith.constant 0 : i32
    %c0_i32_1 = arith.constant 0 : i32
    %c0_i32_2 = arith.constant 0 : i32
    return %c0_i32, %c0_i32_0, %c0_i32_1 : i32, i32, i32
  }
  func.func @transform_4(%arg0: i32) -> (i32, i32) {
    %c0_i32 = arith.constant 0 : i32
    %c0_i32_0 = arith.constant 0 : i32
    %c0_i32_1 = arith.constant 0 : i32
    return %c0_i32, %c0_i32_0 : i32, i32
  }
  func.func @transform_5(%arg0: i32) -> (i32, i32) {
    %c0_i32 = arith.constant 0 : i32
    %c0_i32_0 = arith.constant 0 : i32
    %c0_i32_1 = arith.constant 0 : i32
    return %c0_i32, %c0_i32_0 : i32, i32
  }
  func.func @transform_6(%arg0: i32) -> (i32, i32) {
    %c0_i32 = arith.constant 0 : i32
    %c0_i32_0 = arith.constant 0 : i32
    %c0_i32_1 = arith.constant 0 : i32
    return %c0_i32, %c0_i32_0 : i32, i32
  }
  func.func @transform_7(%arg0: i32) -> (i32, i32) {
    %c0_i32 = arith.constant 0 : i32
    %c0_i32_0 = arith.constant 0 : i32
    %c0_i32_1 = arith.constant 0 : i32
    return %c0_i32, %c0_i32_0 : i32, i32
  }
  func.func @transform_8(%arg0: i32) -> (i32, i32) {
    %c0_i32 = arith.constant 0 : i32
    %c0_i32_0 = arith.constant 0 : i32
    %c0_i32_1 = arith.constant 0 : i32
    return %c0_i32, %c0_i32_0 : i32, i32
  }
  func.func @transform_9(%arg0: i32) -> (i32, i32) {
    %c0_i32 = arith.constant 0 : i32
    %c0_i32_0 = arith.constant 0 : i32
    %c0_i32_1 = arith.constant 0 : i32
    return %c0_i32, %c0_i32_0 : i32, i32
  }
  func.func @transform_10(%arg0: i32) -> (i32, i32) {
    %c0_i32 = arith.constant 0 : i32
    %c0_i32_0 = arith.constant 0 : i32
    %c0_i32_1 = arith.constant 0 : i32
    return %c0_i32, %c0_i32_0 : i32, i32
  }
  func.func @transform_11(%arg0: i32) -> (i32, i32) {
    %c0_i32 = arith.constant 0 : i32
    %c0_i32_0 = arith.constant 0 : i32
    %c0_i32_1 = arith.constant 0 : i32
    return %c0_i32, %c0_i32_0 : i32, i32
  }
  func.func @transform_12(%arg0: i32) -> (i32, i32) {
    %c0_i32 = arith.constant 0 : i32
    %c0_i32_0 = arith.constant 0 : i32
    %c0_i32_1 = arith.constant 0 : i32
    return %c0_i32, %c0_i32_0 : i32, i32
  }
  func.func @transform_13(%arg0: i32) -> (i32, i32, i32) {
    %c0_i32 = arith.constant 0 : i32
    %c0_i32_0 = arith.constant 0 : i32
    %c0_i32_1 = arith.constant 0 : i32
    return %arg0, %c0_i32, %c0_i32_0 : i32, i32, i32
  }
}

</mosaic_0001>

<bundles_post_ra>
// kernel: tpu_custom_call.1
= control target key start
LH: loop header
LB: loop body
LE: loop exit
PB: predicated region body
PF: predicated region fallthrough
CT: control target
= control target key end

     0   :  { %s2196_s0 = inlined_call_operand.vmem [shape: f32[2,8,32], index: 0, kind: input, shape index: {}]   ;;  %s2197_s1 = inlined_call_operand.vmem [shape: f32[2,1,8], index: 1, kind: input, shape index: {}]   ;;  %s2198_s2 = inlined_call_operand.vmem [shape: bf16[32,96], index: 2, kind: input, shape index: {}]   ;;  %s2199_s3 = inlined_call_operand.vmem [shape: bf16[4,8,32], index: 3, kind: input, shape index: {}]   ;;  %s2200_s4 = inlined_call_operand.vmem [shape: f32[1,32], index: 4, kind: input, shape index: {}]   ;;  %s2201_s5 = inlined_call_operand.vmem [shape: f32[1,32], index: 5, kind: input, shape index: {}]   ;;  %s2202_s6 = inlined_call_operand.vmem [shape: f32[1,32], index: 6, kind: input, shape index: {}]   ;;  %s2203_s7 = inlined_call_operand.vmem [shape: bf16[32,128], index: 7, kind: input, shape index: {}]   ;;  %s2204_s8 = inlined_call_operand.vmem [shape: f32[1,128], index: 8, kind: input, shape index: {}]   ;;  %s2205_s9 = inlined_call_operand.vmem [shape: bf16[128,32], index: 9, kind: input, shape index: {}]   ;;  %s2206_s10 = inlined_call_operand.vmem [shape: f32[1,32], index: 10, kind: input, shape index: {}]   ;;  %s2207_s11 = inlined_call_operand.vmem [shape: f32[1,32], index: 11, kind: input, shape index: {}]   ;;  %s2208_s12 = inlined_call_operand.vmem [shape: f32[1,32], index: 12, kind: input, shape index: {}]   ;;  %s2209_s13 = inlined_call_operand.hbm [shape: f32[2,8,32], index: 13, kind: output, shape index: {}]  }
   0x1   :  { %2210 = sst [smem:[#allocation5_spill]] %s2196_s0 }
   0x2   :  { %2211 = sst [smem:[#allocation6_spill]] %s2197_s1 }
   0x3   :  { %2212 = sst [smem:[#allocation7_spill]] %s2198_s2 }
   0x4   :  { %2213 = sst [smem:[#allocation8_spill]] %s2199_s3 }
   0x5   :  { %2214 = sst [smem:[#allocation9_spill]] %s2200_s4 }
   0x6   :  { %18 = vsyncpa [#allocation3], 0 }
   0x7   :  { %20 = vsyncpa [#allocation3 + $0x1], 0  ;;  %s1909_s25 = smov 0   ;;  %s1911_s26 = smov 0  }
   0x8   :  { %s1913_s27 = smov 0   ;;  %s1915_s28 = smov 0  }
   0x9 LB: > { %s1930_s29 = sadd.s32 4294967295, %s1823_s28   ;;  %s1488_s30 = sadd.s32 4294967294, %s1823_s28   ;;  %s1823_s28 = sphi %s1915_s28, %s2225_s28   ;;  %s1819_s27 = sphi %s1913_s27, %s2224_s27   ;;  %s1815_s26 = sphi %s1911_s26, %s2223_s26   ;;  %s1811_s25 = sphi %s1909_s25, %s2222_s25  }
   0xa   : > { %s1934_s14 = sadd.s32 1, %s1823_s28   ;;  %s316_s15 = sadd.s32 1, %s1819_s27 }
   0xb   : > { %s313_s16 = ssub.s32 %s1823_s28, %s1934_s14  ;;  %p326_p0 = scmp.ne.s32.totalorder %s1819_s27, %s1815_s26 }
   0xc   : > { %p314_p1 = scmp.eq.s32.totalorder %s313_s16, 0  ;;  %p327_p2 = scmp.eq.s32.totalorder %s1930_s29, 1 }
   0xd   : > { %p332_p3 = scmp.ne.s32.totalorder %s1815_s26, %s1811_s25  ;;  %p333_p4 = scmp.eq.s32.totalorder %s1488_s30, 1 }
   0xe   : > { %s1945_s17 = scalar_select %p314_p1, %s1819_s27, %s316_s15  }
   0xf   : > { %p1947_p5 = por %p327_p2, %p326_p0  ;;  %p1951_p6 = por %p333_p4, %p332_p3 }
  0x10   : > { %p1491_p7 = scmp.ge.s32.totalorder %s1823_s28, 1  ;;  %p397_p8 = scmp.lt.s32.totalorder %s1823_s28, 3 }
  0x12   : > { %p398_p9 = pnand %p1491_p7, %p397_p8 }
  0x13   : > { %s2217_s2 = sld [smem:[#allocation7_spill]] (!%p398_p9)  ;;  %p443_p10 = scmp.lt.s32.totalorder (!%p398_p9), %s1930_s29, 1 }
  0x14   : > { %401 = sbr.rel (%p398_p9) target bundleno = 4028 (0xfbc), region = 72  ;;  %s2218_s0 = sld [smem:[#allocation5_spill]] (!%p398_p9) }
  0x15   : > { %s1827_s21 = smov (!%p398_p9), 64   ;;  %s1828_s22 = smov (!%p398_p9), 96  }
  0x16   : > { %s2219_s1 = sld [smem:[#allocation6_spill]] (!%p398_p9)  ;;  %s1830_s16 = smov (!%p398_p9), 120  }
  0x17   : > { %s2220_s3 = sld [smem:[#allocation8_spill]] (!%p398_p9)  ;;  %s1529_s23 = sshll.u32 (!%p398_p9), %s1930_s29, 7 }
  0x18   : > { %s2221_s4 = sld [smem:[#allocation9_spill]] (!%p398_p9) }
  0x19   : > { %v1731_v0 = vld [vmem:[%s2217_s2 + $0x8] sm:$0xff]   ;;  %v1825_v1 = vmov 0.0   ;;  %v1732_v2 = vld [vmem:[%s2217_s2] sm:$0xff]   ;;  %vm1826_vm0 = vmmov 0   ;;  %s1972_s24 = scalar_select %p443_p10, %s1930_s29, 1  ;;  %vm481_vm1 = vcmask 261120  }
  0x1a   : > { %1571 = vmatprep.subr.bf16.mxu1 %v1825_v1  ;;  %1597 = vmatprep.subr.bf16.mxu0 %v1825_v1  ;;  %vm535_vm2 = vcmask 64512   ;;  %vm599_vm3 = vcmask 1043456  }
  0x1b   : > { %1572 = vmatpush3.bf16.msra.mxu1 %v1731_v0  ;;  %1575 = vmatprep.mubr.msk.bf16.mxu1 %vm1826_vm0, %v1825_v1  ;;  %s1493_s30 = sshll.u32 %s1972_s24, 3 }
  0x1c   : > { %1573 = vmatprep.subr.bf16.mxu1 %v1825_v1  ;;  %1599 = vmatprep.mubr.msk.bf16.mxu0 %vm1826_vm0, %v1825_v1  ;;  %s446_s20 = scalar_lea.vmem %s2218_s0, %s1493_s30  ;;  %s449_s15 = scalar_lea.vmem %s2219_s1, %s1972_s24 }
  0x1d   : > { %v1979_v3 = vld [vmem:[%s446_s20] sm:$0xff]  ;;  %s1829_s24 = smov 88   ;;  %s1831_s20 = smov 56  }
  0x1e   : > { %v464_v4 = vpack.c.bf16 %v1979_v3, %v1979_v3  ;;  %v2002_v14 = vld [vmem:[%s449_s15] ss:$0 sm:$0xff]  ;;  %v459_v48 = vld [vmem:[%s2220_s3 + $0x4] sm:$0xf]  ;;  %s1837_s30 = smov 40   ;;  %s440_s15 = sand.u32 1, %s1815_s26  }
  0x1f   : > { %1574 = vmatpush3.bf16.msra.mxu1 %v1732_v2  ;;  %v759_v49 = vsel %vm599_vm3, %v459_v48, 0  ;;  %v458_v54 = vld [vmem:[%s2220_s3] sm:$0xf] }
  0x20   : > { %1579 = vmatprep.subr.bf16.mxu1 %v1825_v1  ;;  %v805_v57 = vsel %vm599_vm3, %v458_v54, 0 }
  0x22   : > { %1576 = vmatmul.mubr.msk.bf16.vlgmr.msra.gmra.mxu1 %vm481_vm1, %v464_v4 }
  0x23   : > { %1581 = vmatprep.mubr.msk.bf16.mxu1 %vm1826_vm0, %v1825_v1 }
  0xe2   : > { %v519_v5 = vpop.f32.mrf.mxu1 }
  0xe3   : > { %v1986_v6 = vpack.c.bf16 %v519_v5, %v519_v5 }
  0xe4   : > { %v1577_v7 = vpop.f32.mrf.mxu1 }
  0xe5   : > { %594 = vrot.lane.b32.xlu1 %v1986_v6, %s1827_s21  ;;  %533 = vrot.lane.b32.xlu0 %v1986_v6, %s1828_s22  ;;  %s1832_s21 = smov 80   ;;  %s1833_s22 = smov 112  }
  0xe6   : > { %v522_v8 = vpop.f32.mrf.mxu1 }
  0xe8   : > { %v1578_v9 = vpop.f32.mrf.mxu1 }
 0x157   : > { %v534_v10 = vpop.permute.xlu0 %533  ;;  %v595_v12 = vpop.permute.xlu1 %594 }
 0x158   : > { %v540_v11 = vsel %vm535_vm2, %v534_v10, 0  ;;  %v601_v13 = vsel %vm599_vm3, %v595_v12, 0 }
 0x159   : > { %1580 = vmatpush3.bf16.xpose.msra.mxu1 %v540_v11 }
 0x15a   : > { %1585 = vmatprep.subr.bf16.mxu1 %v1825_v1 }
 0x160   : > { %1582 = vmatmul.mubr.msk.bf16.vlgmr.msra.gmra.mxu1 %vm535_vm2, %v1986_v6 }
 0x161   : > { %1586 = vmatpush3.bf16.msra.mxu1 %v601_v13  ;;  %1587 = vmatprep.mubr.msk.bf16.mxu1 %vm1826_vm0, %v1825_v1 }
 0x162   : > { %1591 = vmatprep.subr.bf16.mxu1 %v1825_v1 }
 0x220   : > { %v576_v15 = vpop.f32.mrf.mxu1 }
 0x221   : > { %v577_v16 = vadd.f32 %v2002_v14, %v576_v15 }
 0x222   : > { %v1583_v17 = vpop.f32.mrf.mxu1 }
 0x223   : > { %v582_v18 = vsel %vm535_vm2, %v577_v16, -inf }
 0x224   : > { %583 = vmax.xlane.f32.xlu0 %v582_v18  ;;  %v579_v19 = vpop.f32.mrf.mxu1 }
 0x226   : > { %v1584_v20 = vpop.f32.mrf.mxu1 }
 0x2ad   : > { %v584_v21 = vpop.xlane.xlu0 %583 }
 0x2ae   : > { %v585_v22 = vsub.f32 %v577_v16, %v584_v21 }
 0x2b0   : > { %v586_v23 = vmul.f32 1.442695, %v585_v22 }
 0x2b2   : > { %1743 = vpow2.f32 %v586_v23 }
 0x2bf   : > { %v1744_v24 = vpop.eup %1743 }
 0x2c0   : > { %v588_v25 = vsel %vm535_vm2, %v1744_v24, 0.0 }
 0x2c1   : > { %589 = vadd.xlane.f32.xlu1 %v588_v25 }
 0x2d2   : > { %646 = vrot.lane.b32.xlu1 %v1986_v6, %s1829_s24  ;;  %s1492_s24 = sshll.u32 %s440_s15, 3 }
 0x2d6   : > { %644 = vrot.lane.b32.xlu1 %v1986_v6, %s1830_s16  ;;  %s1834_s16 = smov 48  }
 0x34a   : > { %v590_v26 = vpop.xlane.xlu1 %589 }
 0x34b   : > { %1745 = vrcp.f32 %v590_v26 }
 0x34e   : > { %v647_v29 = vpop.permute.xlu1 %646 }
 0x34f   : > { %v652_v31 = vsel %vm535_vm2, %v647_v29, 0 }
 0x352   : > { %v645_v32 = vpop.permute.xlu1 %644 }
 0x358   : > { %v1746_v27 = vpop.eup %1745 }
 0x359   : > { %v592_v28 = vmul.f32 %v1746_v27, %v1744_v24 }
 0x35b   : > { %v593_v30 = vpack.c.bf16 %v592_v28, %v592_v28 }
 0x35d   : > { %1588 = vmatmul.mubr.msk.bf16.vlgmr.msra.gmra.mxu1 %vm535_vm2, %v593_v30 }
 0x35e   : > { %1592 = vmatpush3.bf16.xpose.msra.mxu1 %v652_v31  ;;  %1593 = vmatprep.mubr.msk.bf16.mxu1 %vm1826_vm0, %v1825_v1 }
 0x35f   : > { %1603 = vmatprep.subr.bf16.mxu1 %v1825_v1 }
 0x365   : > { %1594 = vmatmul.mubr.msk.bf16.vlgmr.msra.gmra.mxu1 %vm535_vm2, %v645_v32 }
 0x366   : > { %1605 = vmatprep.mubr.msk.bf16.mxu1 %vm1826_vm0, %v1825_v1  ;;  %1604 = vmatpush3.bf16.msra.mxu1 %v759_v49 }
 0x367   : > { %1615 = vmatprep.subr.bf16.mxu1 %v1825_v1 }
 0x41d   : > { %v637_v33 = vpop.f32.mrf.mxu1 }
 0x41e   : > { %v643_v58 = vpack.c.bf16 %v637_v33, %v637_v33 }
 0x41f   : > { %v1589_v34 = vpop.f32.mrf.mxu1 }
 0x421   : > { %v640_v35 = vpop.f32.mrf.mxu1 }
 0x422   : > { %v460_v35 = vld [vmem:[%s2220_s3 + $0x8] sm:$0xf] }
 0x423   : > { %v1590_v36 = vpop.f32.mrf.mxu1 }
 0x424   : > { %v962_v36 = vsel %vm599_vm3, %v460_v35, 0  ;;  %v1511_v35 = vld [vmem:[%s2201_s5] ss:$0 sm:$0xff] }
 0x425   : > { %v688_v37 = vpop.f32.mrf.mxu1 }
 0x426   : > { %v689_v38 = vadd.f32 %v2002_v14, %v688_v37 }
 0x427   : > { %v1595_v39 = vpop.f32.mrf.mxu1 }
 0x428   : > { %v694_v40 = vsel %vm535_vm2, %v689_v38, -inf }
 0x429   : > { %695 = vmax.xlane.f32.xlu1 %v694_v40  ;;  %v691_v41 = vpop.f32.mrf.mxu1 }
 0x42b   : > { %v1596_v42 = vpop.f32.mrf.mxu1 }
 0x4b2   : > { %v696_v43 = vpop.xlane.xlu1 %695 }
 0x4b3   : > { %v697_v44 = vsub.f32 %v689_v38, %v696_v43 }
 0x4b5   : > { %v698_v45 = vmul.f32 1.442695, %v697_v44 }
 0x4b7   : > { %1747 = vpow2.f32 %v698_v45 }
 0x4c4   : > { %v1748_v46 = vpop.eup %1747 }
 0x4c5   : > { %v700_v47 = vsel %vm535_vm2, %v1748_v46, 0.0 }
 0x4c6   : > { %701 = vadd.xlane.f32.xlu0 %v700_v47 }
 0x4dc   : > { %706 = vrot.lane.b32.xlu0 %v1986_v6, %s1831_s20  ;;  %s1835_s20 = smov 72  }
 0x4e0   : > { %849 = vrot.lane.b32.xlu0 %v1986_v6, %s1832_s21  ;;  %s1836_s21 = smov 104  }
 0x4e4   : > { %847 = vrot.lane.b32.xlu0 %v1986_v6, %s1833_s22 }
 0x54f   : > { %v702_v50 = vpop.xlane.xlu0 %701 }
 0x550   : > { %1749 = vrcp.f32 %v702_v50 }
 0x553   : > { %v707_v51 = vpop.permute.xlu0 %706 }
 0x554   : > { %v712_v52 = vsel %vm599_vm3, %v707_v51, 0 }
 0x555   : > { %1598 = vmatpush3.bf16.msra.mxu0 %v712_v52 }
 0x556   : > { %1609 = vmatprep.subr.bf16.mxu0 %v1825_v1 }
 0x557   : > { %v850_v59 = vpop.permute.xlu0 %849 }
 0x558   : > { %v855_v63 = vsel %vm535_vm2, %v850_v59, 0 }
 0x55b   : > { %v848_v5 = vpop.permute.xlu0 %847 }
 0x55d   : > { %v1750_v53 = vpop.eup %1749 }
 0x55e   : > { %v704_v55 = vmul.f32 %v1750_v53, %v1748_v46 }
 0x560   : > { %v705_v56 = vpack.c.bf16 %v704_v55, %v704_v55 }
 0x562   : > { %1600 = vmatmul.mubr.msk.bf16.vlgmr.msra.gmra.mxu0 %vm535_vm2, %v705_v56  ;;  %v461_v56 = vld [vmem:[%s2220_s3 + $0xc] sm:$0xf]  ;;  %s1418_s3 = scalar_lea.hbm %s2209_s13, %s1529_s23 }
 0x563   : > { %1610 = vmatpush3.bf16.msra.mxu0 %v805_v57  ;;  %1611 = vmatprep.mubr.msk.bf16.mxu0 %vm1826_vm0, %v1825_v1  ;;  %v1120_v57 = vsel %vm599_vm3, %v461_v56, 0 }
 0x564   : > { %1621 = vmatprep.subr.bf16.mxu0 %v1825_v1 }
 0x56a   : > { %1612 = vmatmul.mubr.msk.bf16.vlgmr.msra.gmra.mxu0 %vm535_vm2, %v643_v58 }
 0x56b   : > { %1623 = vmatprep.mubr.msk.bf16.mxu0 %vm1826_vm0, %v1825_v1 }
 0x622   : > { %v748_v60 = vpop.f32.mrf.mxu0 }
 0x623   : > { %v754_v61 = vpack.c.bf16 %v748_v60, %v748_v60 }
 0x624   : > { %v1601_v62 = vpop.f32.mrf.mxu0 }
 0x625   : > { %1606 = vmatmul.mubr.msk.bf16.vlgmr.msra.gmra.mxu1 %vm535_vm2, %v754_v61 }
 0x626   : > { %1616 = vmatpush3.bf16.xpose.msra.mxu1 %v855_v63  ;;  %v751_v0 = vpop.f32.mrf.mxu0  ;;  %1617 = vmatprep.mubr.msk.bf16.mxu1 %vm1826_vm0, %v1825_v1 }
 0x627   : > { %1627 = vmatprep.subr.bf16.mxu1 %v1825_v1 }
 0x628   : > { %v1602_v2 = vpop.f32.mrf.mxu0 }
 0x62a   : > { %v2046_v4 = vpop.f32.mrf.mxu0 }
 0x62c   : > { %v1613_v7 = vpop.f32.mrf.mxu0 }
 0x62d   : > { %1618 = vmatmul.mubr.msk.bf16.vlgmr.msra.gmra.mxu1 %vm535_vm2, %v848_v5 }
 0x62e   : > { %v844_v8 = vpop.f32.mrf.mxu0  ;;  %1629 = vmatprep.mubr.msk.bf16.mxu1 %vm1826_vm0, %v1825_v1  ;;  %1628 = vmatpush3.bf16.msra.mxu1 %v962_v36 }
 0x62f   : > { %1639 = vmatprep.subr.bf16.mxu1 %v1825_v1 }
 0x630   : > { %v1614_v9 = vpop.f32.mrf.mxu0 }
 0x631   : > { %v1510_v9 = vld [vmem:[%s2221_s4] ss:$0 sm:$0xff]  ;;  %s1407_s4 = scalar_lea.sflag [#allocation3], %s440_s15 }
 0x6e5   : > { %v2051_v10 = vpop.f32.mrf.mxu1 }
 0x6e7   : > { %v1607_v11 = vpop.f32.mrf.mxu1 }
 0x6e9   : > { %v798_v12 = vpop.f32.mrf.mxu1 }
 0x6eb   : > { %v1608_v13 = vpop.f32.mrf.mxu1 }
 0x6ed   : > { %v891_v15 = vpop.f32.mrf.mxu1 }
 0x6ee   : > { %v892_v16 = vadd.f32 %v2002_v14, %v891_v15 }
 0x6ef   : > { %v1619_v17 = vpop.f32.mrf.mxu1 }
 0x6f0   : > { %v897_v18 = vsel %vm535_vm2, %v892_v16, -inf }
 0x6f1   : > { %898 = vmax.xlane.f32.xlu1 %v897_v18  ;;  %v894_v19 = vpop.f32.mrf.mxu1 }
 0x6f3   : > { %v1620_v20 = vpop.f32.mrf.mxu1 }
 0x702   : > { %909 = vrot.lane.b32.xlu1 %v1986_v6, %s1834_s16 }
 0x706   : > { %1007 = vrot.lane.b32.xlu1 %v1986_v6, %s1835_s20  ;;  %s1838_s20 = smov [#allocation2]  }
 0x70a   : > { %1005 = vrot.lane.b32.xlu1 %v1986_v6, %s1836_s21  ;;  %s1767_s21 = sshll.u32 %s1838_s20, 4  ;;  %s1768_s21 = int_to_ptr.vmem [resolvable:$false] %s1767_s21 }
 0x70b   : > { %s1769_s29 = scalar_lea.vmem %s1768_s21, 256 }
 0x77a   : > { %v899_v21 = vpop.xlane.xlu1 %898 }
 0x77b   : > { %v900_v22 = vsub.f32 %v892_v16, %v899_v21 }
 0x77d   : > { %v901_v23 = vmul.f32 1.442695, %v900_v22 }
 0x77e   : > { %v910_v24 = vpop.permute.xlu1 %909 }
 0x77f   : > { %1751 = vpow2.f32 %v901_v23  ;;  %v915_v25 = vsel %vm599_vm3, %v910_v24, 0  ;;  %v1733_v24 = vld [vmem:[%s2203_s7 + $0x8] sm:$0xff]  }
 0x780   : > { %1622 = vmatpush3.bf16.msra.mxu0 %v915_v25  ;;  %v1735_v25 = vld [vmem:[%s2205_s9 + $0x38] sm:$0xff]  }
 0x781   : > { %1633 = vmatprep.subr.bf16.mxu0 %v1825_v1 }
 0x782   : > { %v1008_v31 = vpop.permute.xlu1 %1007 }
 0x783   : > { %v1013_v33 = vsel %vm535_vm2, %v1008_v31, 0 }
 0x786   : > { %v1006_v34 = vpop.permute.xlu1 %1005 }
 0x78c   : > { %v1752_v26 = vpop.eup %1751 }
 0x78d   : > { %v903_v27 = vsel %vm535_vm2, %v1752_v26, 0.0 }
 0x78e   : > { %904 = vadd.xlane.f32.xlu0 %v903_v27  ;;  %v1737_v27 = vld [vmem:[%s2205_s9 + $0x28] sm:$0xff]  }
 0x817   : > { %v905_v28 = vpop.xlane.xlu0 %904 }
 0x818   : > { %1753 = vrcp.f32 %v905_v28  ;;  %v1738_v28 = vld [vmem:[%s2205_s9 + $0x20] sm:$0xff]  }
 0x825   : > { %v1754_v29 = vpop.eup %1753 }
 0x826   : > { %v907_v30 = vmul.f32 %v1754_v29, %v1752_v26  ;;  %v1736_v26 = vld [vmem:[%s2205_s9 + $0x30] sm:$0xff]   ;;  %v1739_v29 = vld [vmem:[%s2205_s9 + $0x18] sm:$0xff]  }
 0x828   : > { %v908_v32 = vpack.c.bf16 %v907_v30, %v907_v30  ;;  %v1740_v30 = vld [vmem:[%s2205_s9 + $0x10] sm:$0xff]  }
 0x82a   : > { %1624 = vmatmul.mubr.msk.bf16.vlgmr.msra.gmra.mxu0 %vm535_vm2, %v908_v32 }
 0x82b   : > { %1634 = vmatpush3.bf16.xpose.msra.mxu0 %v1013_v33  ;;  %1635 = vmatprep.mubr.msk.bf16.mxu0 %vm1826_vm0, %v1825_v1 }
 0x82c   : > { %1645 = vmatprep.subr.bf16.mxu0 %v1825_v1 }
 0x832   : > { %1636 = vmatmul.mubr.msk.bf16.vlgmr.msra.gmra.mxu0 %vm535_vm2, %v1006_v34 }
 0x833   : > { %1647 = vmatprep.mubr.msk.bf16.mxu0 %vm1826_vm0, %v1825_v1  ;;  %1646 = vmatpush3.bf16.msra.mxu0 %v1120_v57 }
 0x834   : > { %1659 = vmatprep.subr.bf16.mxu0 %v1825_v1 }
 0x8ea   : > { %v951_v37 = vpop.f32.mrf.mxu0 }
 0x8eb   : > { %v957_v38 = vpack.c.bf16 %v951_v37, %v951_v37  ;;  %v1512_v37 = vld [vmem:[%s2202_s6] ss:$0 sm:$0xff] }
 0x8ec   : > { %v1625_v39 = vpop.f32.mrf.mxu0 }
 0x8ed   : > { %1630 = vmatmul.mubr.msk.bf16.vlgmr.msra.gmra.mxu1 %vm535_vm2, %v957_v38 }
 0x8ee   : > { %v954_v40 = vpop.f32.mrf.mxu0  ;;  %1641 = vmatprep.mubr.msk.bf16.mxu1 %vm1826_vm0, %v1825_v1 }
 0x8f0   : > { %v1626_v41 = vpop.f32.mrf.mxu0 }
 0x8f1   : > { %v1741_v41 = vld [vmem:[%s2205_s9 + $0x8] sm:$0xff]  }
 0x8f2   : > { %v1049_v42 = vpop.f32.mrf.mxu0 }
 0x8f3   : > { %v1050_v43 = vadd.f32 %v2002_v14, %v1049_v42  ;;  %v842_v14 = vadd.f32 %v2046_v4, %v2051_v10  ;;  %v1742_v42 = vld [vmem:[%s2205_s9] sm:$0xff]  }
 0x8f4   : > { %v1637_v44 = vpop.f32.mrf.mxu0 }
 0x8f5   : > { %v1055_v45 = vsel %vm535_vm2, %v1050_v43, -inf }
 0x8f6   : > { %1056 = vmax.xlane.f32.xlu1 %v1055_v45  ;;  %v1052_v46 = vpop.f32.mrf.mxu0 }
 0x8f8   : > { %v1638_v47 = vpop.f32.mrf.mxu0 }
 0x97f   : > { %v1057_v48 = vpop.xlane.xlu1 %1056 }
 0x980   : > { %v1058_v49 = vsub.f32 %v1050_v43, %v1057_v48  ;;  %v1513_v43 = vld [vmem:[%s2204_s8] ss:$0 sm:$0xff] }
 0x982   : > { %v1059_v50 = vmul.f32 1.442695, %v1058_v49 }
 0x984   : > { %1755 = vpow2.f32 %v1059_v50 }
 0x991   : > { %v1756_v51 = vpop.eup %1755 }
 0x992   : > { %v1061_v52 = vsel %vm535_vm2, %v1756_v51, 0.0 }
 0x993   : > { %1062 = vadd.xlane.f32.xlu0 %v1061_v52 }
 0x9a9   : > { %1067 = vrot.lane.b32.xlu0 %v1986_v6, %s1837_s30  ;;  %s442_s30 = scalar_lea.vmem [#allocation2], %s1492_s24 }
 0x9aa   : > { %s1420_s0 = sshll.u32 %s442_s30, 4  ;;  %s1421_s0 = int_to_ptr.vmem [resolvable:$true] %s1420_s0 }
 0x9ab   : > { %s1763_s16 = scalar_lea.vmem %s1421_s0, 128  ;;  %p1770_p0 = scmp.lt.s32.totalorder %s1421_s0, %s1768_s21 }
 0x9ac   : > { %p1764_p11 = scmp.ne.s32.totalorder %s1421_s0, %s1763_s16  ;;  %p1771_p1 = scmp.lt.s32.totalorder %s1769_s29, %s1763_s16 }
 0x9ad   : > { %v998_v53 = vpop.f32.mrf.mxu1 }
 0x9ae   : > { %v1004_v54 = vadd.f32 %v998_v53, %v842_v14  ;;  %p1765_p12 = pnand %p1764_p11, %p1947_p5  ;;  %p1772_p2 = por %p1771_p1, %p1770_p0 }
 0x9af   : > { %v1631_v55 = vpop.f32.mrf.mxu1 }
 0x9b0   : > { %p1766_p13 = pneg %p1765_p12 }
 0x9b1   : > { %v1001_v58 = vpop.f32.mrf.mxu1 }
 0x9b2   : > { %p1773_p3 = pnand %p1772_p2, %p1766_p13 }
 0x9b3   : > { %v1632_v59 = vpop.f32.mrf.mxu1 }
 0xa1c   : > { %v1063_v60 = vpop.xlane.xlu0 %1062 }
 0xa1d   : > { %1757 = vrcp.f32 %v1063_v60 }
 0xa20   : > { %v1068_v6 = vpop.permute.xlu0 %1067 }
 0xa21   : > { %v1073_v61 = vsel %vm599_vm3, %v1068_v6, 0 }
 0xa22   : > { %1640 = vmatpush3.bf16.msra.mxu1 %v1073_v61 }
 0xa23   : > { %1651 = vmatprep.subr.bf16.mxu1 %v1825_v1 }
 0xa2a   : > { %v1758_v62 = vpop.eup %1757 }
 0xa2b   : > { %v1065_v63 = vmul.f32 %v1758_v62, %v1756_v51 }
 0xa2d   : > { %v1066_v0 = vpack.c.bf16 %v1065_v63, %v1065_v63 }
 0xa2f   : > { %1642 = vmatmul.mubr.msk.bf16.vlgmr.msra.gmra.mxu1 %vm535_vm2, %v1066_v0 }
 0xa30   : > { %1655 = vmatprep.mubr.msk.bf16.mxu1 %vm1826_vm0, %v1825_v1  ;;  %1652 = vmatpush3.bf16.msra.mxu1 %v1733_v24 }
 0xa31   : > { %1653 = vmatprep.subr.bf16.mxu1 %v1825_v1 }
 0xaef   : > { %v1109_v2 = vpop.f32.mrf.mxu1 }
 0xaf0   : > { %v1115_v4 = vpack.c.bf16 %v1109_v2, %v1109_v2  ;;  %v1526_v2 = vld [vmem:[%s2207_s11] ss:$0 sm:$0xff] }
 0xaf1   : > { %v1643_v5 = vpop.f32.mrf.mxu1 }
 0xaf2   : > { %1648 = vmatmul.mubr.msk.bf16.vlgmr.msra.gmra.mxu0 %vm535_vm2, %v1115_v4  ;;  %v1527_v5 = vld [vmem:[%s2208_s12] ss:$0 sm:$0xff] }
 0xaf3   : > { %v1112_v7 = vpop.f32.mrf.mxu1  ;;  %1675 = vmatprep.mubr.msk.bf16.mxu0 %vm1826_vm0, %v1825_v1  ;;  %1660 = vmatpush3.bf16.msra.mxu0 %v1735_v25 }
 0xaf4   : > { %1661 = vmatprep.subr.bf16.mxu0 %v1825_v1 }
 0xaf5   : > { %v1644_v8 = vpop.f32.mrf.mxu1 }
 0xaf7   : > { %1662 = vmatpush3.bf16.msra.mxu0 %v1736_v26 }
 0xaf8   : > { %1663 = vmatprep.subr.bf16.mxu0 %v1825_v1 }
 0xafb   : > { %1664 = vmatpush3.bf16.msra.mxu0 %v1737_v27 }
 0xafc   : > { %1665 = vmatprep.subr.bf16.mxu0 %v1825_v1 }
 0xaff   : > { %1666 = vmatpush3.bf16.msra.mxu0 %v1738_v28 }
 0xb00   : > { %1667 = vmatprep.subr.bf16.mxu0 %v1825_v1 }
 0xb03   : > { %1668 = vmatpush3.bf16.msra.mxu0 %v1739_v29 }
 0xb04   : > { %1669 = vmatprep.subr.bf16.mxu0 %v1825_v1 }
 0xb07   : > { %1670 = vmatpush3.bf16.msra.mxu0 %v1740_v30 }
 0xb08   : > { %1671 = vmatprep.subr.bf16.mxu0 %v1825_v1 }
 0xb0b   : > { %1672 = vmatpush3.bf16.msra.mxu0 %v1741_v41 }
 0xb0c   : > { %1673 = vmatprep.subr.bf16.mxu0 %v1825_v1  ;;  %v1517_v1 = vld [vmem:[%s2206_s10] ss:$0 sm:$0xff] }
 0xb0f   : > { %1674 = vmatpush3.bf16.msra.mxu0 %v1742_v42 }
 0xbb2   : > { %v1156_v10 = vpop.f32.mrf.mxu0 }
 0xbb3   : > { %v1162_v11 = vadd.f32 %v1156_v10, %v1004_v54 }
 0xbb4   : > { %v1649_v12 = vpop.f32.mrf.mxu0 }
 0xbb5   : > { %v1169_v13 = vadd.f32 %v1510_v9, %v1162_v11 }
 0xbb6   : > { %v1159_v15 = vpop.f32.mrf.mxu0 }
 0xbb7   : > { %v1170_v16 = vadd.f32 %v1169_v13, %v1979_v3  ;;  %v1734_v3 = vld [vmem:[%s2203_s7] sm:$0xff]  }
 0xbb8   : > { %v1650_v17 = vpop.f32.mrf.mxu0  ;;  %1654 = vmatpush3.bf16.msra.mxu1 %v1734_v3 }
 0xbb9   : > { %v1171_v18 = vsel %vm481_vm1, %v1170_v16, 0.0 }
 0xbba   : > { %1172 = vadd.xlane.f32.xlu0 %v1171_v18 }
 0xc43   : > { %v1173_v19 = vpop.xlane.xlu0 %1172 }
 0xc44   : > { %v1175_v20 = vmul.f32 0.03125, %v1173_v19 }
 0xc46   : > { %v1176_v21 = vsub.f32 %v1170_v16, %v1175_v20 }
 0xc48   : > { %v1177_v22 = vmul.f32 %v1176_v21, %v1176_v21 }
 0xc4a   : > { %v1178_v23 = vsel %vm481_vm1, %v1177_v22, 0.0 }
 0xc4b   : > { %1179 = vadd.xlane.f32.xlu1 %v1178_v23 }
 0xcd4   : > { %v1180_v31 = vpop.xlane.xlu1 %1179 }
 0xcd5   : > { %v1181_v32 = vmul.f32 0.03125, %v1180_v31 }
 0xcd7   : > { %v1182_v33 = vadd.f32 1e-05, %v1181_v32 }
 0xcd9   : > { %1759 = vrsqrt.f32 %v1182_v33 }
 0xce6   : > { %v1760_v34 = vpop.eup %1759 }
 0xce7   : > { %v1184_v36 = vmul.f32 %v1760_v34, %v1176_v21 }
 0xce9   : > { %v1191_v38 = vmul.f32 %v1511_v35, %v1184_v36 }
 0xceb   : > { %v1198_v39 = vadd.f32 %v1512_v37, %v1191_v38 }
 0xced   : > { %v1199_v40 = vpack.c.bf16 %v1198_v39, %v1198_v39 }
 0xcef   : > { %1656 = vmatmul.mubr.msk.bf16.vlgmr.msra.gmra.mxu1 %vm481_vm1, %v1199_v40 }
 0xdaf   : > { %v1259_v44 = vpop.f32.mrf.mxu1 }
 0xdb0   : > { %v1260_v45 = vadd.f32 %v1513_v43, %v1259_v44 }
 0xdb1   : > { %v1657_v46 = vpop.f32.mrf.mxu1 }
 0xdb2   : > { %v1265_v47 = vmax.f32 %v1260_v45, 0.0 }
 0xdb3   : > { %v1262_v48 = vpop.f32.mrf.mxu1 }
 0xdb4   : > { %v1266_v49 = vpack.c.bf16 %v1265_v47, %v1265_v47 }
 0xdb5   : > { %v1658_v50 = vpop.f32.mrf.mxu1 }
 0xdb6   : > { %1676 = vmatmul.mubr.bf16.vlgmr.msra.gmra.mxu0 %v1266_v49 }
 0xe76   : > { %v1371_v51 = vpop.f32.mrf.mxu0 }
 0xe77   : > { %v1372_v52 = vadd.f32 %v1517_v1, %v1371_v51 }
 0xe78   : > { %v1677_v14 = vpop.f32.mrf.mxu0 }
 0xe79   : > { %v1377_v53 = vadd.f32 %v1372_v52, %v1198_v39 }
 0xe7a   : > { %v1374_v54 = vpop.f32.mrf.mxu0 }
 0xe7b   : > { %v1378_v55 = vsel %vm481_vm1, %v1377_v53, 0.0 }
 0xe7c   : > { %1379 = vadd.xlane.f32.xlu1 %v1378_v55  ;;  %v1678_v56 = vpop.f32.mrf.mxu0 }
 0xf05   : > { %v1380_v57 = vpop.xlane.xlu1 %1379 }
 0xf06   : > { %v1381_v58 = vmul.f32 0.03125, %v1380_v57 }
 0xf08   : > { %v1382_v59 = vsub.f32 %v1377_v53, %v1381_v58 }
 0xf0a   : > { %v1383_v60 = vmul.f32 %v1382_v59, %v1382_v59 }
 0xf0c   : > { %v1384_v6 = vsel %vm481_vm1, %v1383_v60, 0.0 }
 0xf0d   : > { %1385 = vadd.xlane.f32.xlu1 %v1384_v6 }
 0xf96   : > { %v1386_v61 = vpop.xlane.xlu1 %1385 }
 0xf97   : > { %v1387_v62 = vmul.f32 0.03125, %v1386_v61 }
 0xf99   : > { %v1388_v63 = vadd.f32 1e-05, %v1387_v62 }
 0xf9b   : > { %1761 = vrsqrt.f32 %v1388_v63 }
 0xfa8   : > { %v1762_v0 = vpop.eup %1761 }
 0xfa9   : > { %v1390_v4 = vmul.f32 %v1762_v0, %v1382_v59 }
 0xfab   : > { %v1397_v7 = vmul.f32 %v1526_v2, %v1390_v4 }
 0xfad   : > { %v1404_v8 = vadd.f32 %v1527_v5, %v1397_v7 }
 0xfaf   : > { %1405 = vst.msk [vmem:[%s442_s30] sm:$0xff] %vm481_vm1, %v1404_v8 }
 0xfb0   : > { %1776 = shalt.err (!%p1773_p3)
}
 0xfb1   : > { %s1777_s1 = scalar_lea.hbm %s1418_s3, 128  ;;  %s1781_s24 = scalar_lea.hbm %s2209_s13, 256 }
 0xfb2   : > { %p1778_p4 = scmp.ne.s32.totalorder %s1418_s3, %s1777_s1  ;;  %p1782_p9 = scmp.lt.s32.totalorder %s1418_s3, %s2209_s13 }
 0xfb3   : > { %p1783_p10 = scmp.lt.s32.totalorder %s1781_s24, %s1777_s1 }
 0xfb4   : > { %p1779_p7 = pnand %p1778_p4, %p1947_p5 }
 0xfb5   : > { %p1784_p11 = por %p1783_p10, %p1782_p9 }
 0xfb6   : > { %p1780_p8 = pneg %p1779_p7 }
 0xfb8   : > { %p1785_p12 = pnand %p1784_p11, %p1780_p8 }
 0xfba   : > { %1788 = shalt.err (!%p1785_p12)
}
 0xfbb   : > { %1679 = dma.vmem_to_hbm [thread:$0]  (%p1947_p5), %s1421_s0, 128, %s1418_s3, %s1407_s4  }
 0xfbc PF: > { %p1685_p13 = scmp.ge.s32.totalorder %s1823_s28, 2  ;;  %s1432_s30 = sand.u32 1, %s1811_s25  }
 0xfbd   : > { %s1433_s16 = scalar_lea.sflag [#allocation3], %s1432_s30 }
 0xfbe   : > { %p1682_p0 = pnand %p1685_p13, %p1951_p6 }
 0xfc0   : > { %p1683_p1 = pneg %p1682_p0 }
 0xfc2   : > { %1806 = dma.done.wait (%p1683_p1), %s1433_s16, 128  }
 0xfc3   : > { %1808 = vsyncadd (%p1683_p1), %s1433_s16, 4294967168  ;;  %p23_p2 = scmp.ge.s32.totalorder %s1934_s14, 4   ;;  %s2222_s25 = smov %s1815_s26 }
 0xfc4   : > { %s2223_s26 = smov %s1819_s27  ;;  %s2224_s27 = smov %s1945_s17 }
 0xfc5   : > { %s2225_s28 = smov %s1934_s14  ;;  %25 = sbr.rel (!%p23_p2) target bundleno = 9 (0x9), region = 110 }
 0xfca   :  { %1438 = vsyncpa [#allocation3], 1 }
 0xfcb   :  { %1440 = vsyncpa [#allocation3 + $0x1], 1 }

// kernel: tpu_custom_call.1
= control target key start
LH: loop header
LB: loop body
LE: loop exit
PB: predicated region body
PF: predicated region fallthrough
CT: control target
= control target key end

     0   :  { %s2196_s0 = inlined_call_operand.vmem [shape: f32[2,8,32], index: 0, kind: input, shape index: {}]   ;;  %s2197_s1 = inlined_call_operand.vmem [shape: f32[2,1,8], index: 1, kind: input, shape index: {}]   ;;  %s2198_s2 = inlined_call_operand.vmem [shape: bf16[32,96], index: 2, kind: input, shape index: {}]   ;;  %s2199_s3 = inlined_call_operand.vmem [shape: bf16[4,8,32], index: 3, kind: input, shape index: {}]   ;;  %s2200_s4 = inlined_call_operand.vmem [shape: f32[1,32], index: 4, kind: input, shape index: {}]   ;;  %s2201_s5 = inlined_call_operand.vmem [shape: f32[1,32], index: 5, kind: input, shape index: {}]   ;;  %s2202_s6 = inlined_call_operand.vmem [shape: f32[1,32], index: 6, kind: input, shape index: {}]   ;;  %s2203_s7 = inlined_call_operand.vmem [shape: bf16[32,128], index: 7, kind: input, shape index: {}]   ;;  %s2204_s8 = inlined_call_operand.vmem [shape: f32[1,128], index: 8, kind: input, shape index: {}]   ;;  %s2205_s9 = inlined_call_operand.vmem [shape: bf16[128,32], index: 9, kind: input, shape index: {}]   ;;  %s2206_s10 = inlined_call_operand.vmem [shape: f32[1,32], index: 10, kind: input, shape index: {}]   ;;  %s2207_s11 = inlined_call_operand.vmem [shape: f32[1,32], index: 11, kind: input, shape index: {}]   ;;  %s2208_s12 = inlined_call_operand.vmem [shape: f32[1,32], index: 12, kind: input, shape index: {}]   ;;  %s2209_s13 = inlined_call_operand.hbm [shape: f32[2,8,32], index: 13, kind: output, shape index: {}]  }
   0x1   :  { %2210 = sst [smem:[#allocation5_spill]] %s2196_s0 }
   0x2   :  { %2211 = sst [smem:[#allocation6_spill]] %s2197_s1 }
   0x3   :  { %2212 = sst [smem:[#allocation7_spill]] %s2198_s2 }
   0x4   :  { %2213 = sst [smem:[#allocation8_spill]] %s2199_s3 }
   0x5   :  { %2214 = sst [smem:[#allocation9_spill]] %s2200_s4 }
   0x6   :  { %18 = vsyncpa [#allocation3], 0 }
   0x7   :  { %20 = vsyncpa [#allocation3 + $0x1], 0  ;;  %s1909_s25 = smov 0   ;;  %s1911_s26 = smov 0  }
   0x8   :  { %s1913_s27 = smov 0   ;;  %s1915_s28 = smov 0  }
   0x9 LB: > { %s1930_s29 = sadd.s32 4294967295, %s1823_s28   ;;  %s1488_s30 = sadd.s32 4294967294, %s1823_s28   ;;  %s1823_s28 = sphi %s1915_s28, %s2225_s28   ;;  %s1819_s27 = sphi %s1913_s27, %s2224_s27   ;;  %s1815_s26 = sphi %s1911_s26, %s2223_s26   ;;  %s1811_s25 = sphi %s1909_s25, %s2222_s25  }
   0xa   : > { %s1934_s14 = sadd.s32 1, %s1823_s28   ;;  %s316_s15 = sadd.s32 1, %s1819_s27 }
   0xb   : > { %s313_s16 = ssub.s32 %s1823_s28, %s1934_s14  ;;  %p326_p0 = scmp.ne.s32.totalorder %s1819_s27, %s1815_s26 }
   0xc   : > { %p314_p1 = scmp.eq.s32.totalorder %s313_s16, 0  ;;  %p327_p2 = scmp.eq.s32.totalorder %s1930_s29, 1 }
   0xd   : > { %p332_p3 = scmp.ne.s32.totalorder %s1815_s26, %s1811_s25  ;;  %p333_p4 = scmp.eq.s32.totalorder %s1488_s30, 1 }
   0xe   : > { %s1945_s17 = scalar_select %p314_p1, %s1819_s27, %s316_s15  }
   0xf   : > { %p1947_p5 = por %p327_p2, %p326_p0  ;;  %p1951_p6 = por %p333_p4, %p332_p3 }
  0x10   : > { %p1491_p7 = scmp.ge.s32.totalorder %s1823_s28, 1  ;;  %p397_p8 = scmp.lt.s32.totalorder %s1823_s28, 3 }
  0x12   : > { %p398_p9 = pnand %p1491_p7, %p397_p8 }
  0x13   : > { %s2217_s2 = sld [smem:[#allocation7_spill]] (!%p398_p9)  ;;  %p443_p10 = scmp.lt.s32.totalorder (!%p398_p9), %s1930_s29, 1 }
  0x14   : > { %401 = sbr.rel (%p398_p9) target bundleno = 4028 (0xfbc), region = 72  ;;  %s2218_s0 = sld [smem:[#allocation5_spill]] (!%p398_p9) }
  0x15   : > { %s1827_s21 = smov (!%p398_p9), 64   ;;  %s1828_s22 = smov (!%p398_p9), 96  }
  0x16   : > { %s2219_s1 = sld [smem:[#allocation6_spill]] (!%p398_p9)  ;;  %s1830_s16 = smov (!%p398_p9), 120  }
  0x17   : > { %s2220_s3 = sld [smem:[#allocation8_spill]] (!%p398_p9)  ;;  %s1529_s23 = sshll.u32 (!%p398_p9), %s1930_s29, 7 }
  0x18   : > { %s2221_s4 = sld [smem:[#allocation9_spill]] (!%p398_p9) }
  0x19   : > { %v1731_v0 = vld [vmem:[%s2217_s2 + $0x8] sm:$0xff]   ;;  %v1825_v1 = vmov 0.0   ;;  %v1732_v2 = vld [vmem:[%s2217_s2] sm:$0xff]   ;;  %vm1826_vm0 = vmmov 0   ;;  %s1972_s24 = scalar_select %p443_p10, %s1930_s29, 1  ;;  %vm481_vm1 = vcmask 261120  }
  0x1a   : > { %1571 = vmatprep.subr.bf16.mxu1 %v1825_v1  ;;  %1597 = vmatprep.subr.bf16.mxu0 %v1825_v1  ;;  %vm535_vm2 = vcmask 64512   ;;  %vm599_vm3 = vcmask 1043456  }
  0x1b   : > { %1572 = vmatpush3.bf16.msra.mxu1 %v1731_v0  ;;  %1575 = vmatprep.mubr.msk.bf16.mxu1 %vm1826_vm0, %v1825_v1  ;;  %s1493_s30 = sshll.u32 %s1972_s24, 3 }
  0x1c   : > { %1573 = vmatprep.subr.bf16.mxu1 %v1825_v1  ;;  %1599 = vmatprep.mubr.msk.bf16.mxu0 %vm1826_vm0, %v1825_v1  ;;  %s446_s20 = scalar_lea.vmem %s2218_s0, %s1493_s30  ;;  %s449_s15 = scalar_lea.vmem %s2219_s1, %s1972_s24 }
  0x1d   : > { %v1979_v3 = vld [vmem:[%s446_s20] sm:$0xff]  ;;  %s1829_s24 = smov 88   ;;  %s1831_s20 = smov 56  }
  0x1e   : > { %v464_v4 = vpack.c.bf16 %v1979_v3, %v1979_v3  ;;  %v2002_v14 = vld [vmem:[%s449_s15] ss:$0 sm:$0xff]  ;;  %v459_v48 = vld [vmem:[%s2220_s3 + $0x4] sm:$0xf]  ;;  %s1837_s30 = smov 40   ;;  %s440_s15 = sand.u32 1, %s1815_s26  }
  0x1f   : > { %1574 = vmatpush3.bf16.msra.mxu1 %v1732_v2  ;;  %v759_v49 = vsel %vm599_vm3, %v459_v48, 0  ;;  %v458_v54 = vld [vmem:[%s2220_s3] sm:$0xf] }
  0x20   : > { %1579 = vmatprep.subr.bf16.mxu1 %v1825_v1  ;;  %v805_v57 = vsel %vm599_vm3, %v458_v54, 0 }
  0x22   : > { %1576 = vmatmul.mubr.msk.bf16.vlgmr.msra.gmra.mxu1 %vm481_vm1, %v464_v4 }
  0x23   : > { %1581 = vmatprep.mubr.msk.bf16.mxu1 %vm1826_vm0, %v1825_v1 }
  0xe2   : > { %v519_v5 = vpop.f32.mrf.mxu1 }
  0xe3   : > { %v1986_v6 = vpack.c.bf16 %v519_v5, %v519_v5 }
  0xe4   : > { %v1577_v7 = vpop.f32.mrf.mxu1 }
  0xe5   : > { %594 = vrot.lane.b32.xlu1 %v1986_v6, %s1827_s21  ;;  %533 = vrot.lane.b32.xlu0 %v1986_v6, %s1828_s22  ;;  %s1832_s21 = smov 80   ;;  %s1833_s22 = smov 112  }
  0xe6   : > { %v522_v8 = vpop.f32.mrf.mxu1 }
  0xe8   : > { %v1578_v9 = vpop.f32.mrf.mxu1 }
 0x157   : > { %v534_v10 = vpop.permute.xlu0 %533  ;;  %v595_v12 = vpop.permute.xlu1 %594 }
 0x158   : > { %v540_v11 = vsel %vm535_vm2, %v534_v10, 0  ;;  %v601_v13 = vsel %vm599_vm3, %v595_v12, 0 }
 0x159   : > { %1580 = vmatpush3.bf16.xpose.msra.mxu1 %v540_v11 }
 0x15a   : > { %1585 = vmatprep.subr.bf16.mxu1 %v1825_v1 }
 0x160   : > { %1582 = vmatmul.mubr.msk.bf16.vlgmr.msra.gmra.mxu1 %vm535_vm2, %v1986_v6 }
 0x161   : > { %1586 = vmatpush3.bf16.msra.mxu1 %v601_v13  ;;  %1587 = vmatprep.mubr.msk.bf16.mxu1 %vm1826_vm0, %v1825_v1 }
 0x162   : > { %1591 = vmatprep.subr.bf16.mxu1 %v1825_v1 }
 0x220   : > { %v576_v15 = vpop.f32.mrf.mxu1 }
 0x221   : > { %v577_v16 = vadd.f32 %v2002_v14, %v576_v15 }
 0x222   : > { %v1583_v17 = vpop.f32.mrf.mxu1 }
 0x223   : > { %v582_v18 = vsel %vm535_vm2, %v577_v16, -inf }
 0x224   : > { %583 = vmax.xlane.f32.xlu0 %v582_v18  ;;  %v579_v19 = vpop.f32.mrf.mxu1 }
 0x226   : > { %v1584_v20 = vpop.f32.mrf.mxu1 }
 0x2ad   : > { %v584_v21 = vpop.xlane.xlu0 %583 }
 0x2ae   : > { %v585_v22 = vsub.f32 %v577_v16, %v584_v21 }
 0x2b0   : > { %v586_v23 = vmul.f32 1.442695, %v585_v22 }
 0x2b2   : > { %1743 = vpow2.f32 %v586_v23 }
 0x2bf   : > { %v1744_v24 = vpop.eup %1743 }
 0x2c0   : > { %v588_v25 = vsel %vm535_vm2, %v1744_v24, 0.0 }
 0x2c1   : > { %589 = vadd.xlane.f32.xlu1 %v588_v25 }
 0x2d2   : > { %646 = vrot.lane.b32.xlu1 %v1986_v6, %s1829_s24  ;;  %s1492_s24 = sshll.u32 %s440_s15, 3 }
 0x2d6   : > { %644 = vrot.lane.b32.xlu1 %v1986_v6, %s1830_s16  ;;  %s1834_s16 = smov 48  }
 0x34a   : > { %v590_v26 = vpop.xlane.xlu1 %589 }
 0x34b   : > { %1745 = vrcp.f32 %v590_v26 }
 0x34e   : > { %v647_v29 = vpop.permute.xlu1 %646 }
 0x34f   : > { %v652_v31 = vsel %vm535_vm2, %v647_v29, 0 }
 0x352   : > { %v645_v32 = vpop.permute.xlu1 %644 }
 0x358   : > { %v1746_v27 = vpop.eup %1745 }
 0x359   : > { %v592_v28 = vmul.f32 %v1746_v27, %v1744_v24 }
 0x35b   : > { %v593_v30 = vpack.c.bf16 %v592_v28, %v592_v28 }
 0x35d   : > { %1588 = vmatmul.mubr.msk.bf16.vlgmr.msra.gmra.mxu1 %vm535_vm2, %v593_v30 }
 0x35e   : > { %1592 = vmatpush3.bf16.xpose.msra.mxu1 %v652_v31  ;;  %1593 = vmatprep.mubr.msk.bf16.mxu1 %vm1826_vm0, %v1825_v1 }
 0x35f   : > { %1603 = vmatprep.subr.bf16.mxu1 %v1825_v1 }
 0x365   : > { %1594 = vmatmul.mubr.msk.bf16.vlgmr.msra.gmra.mxu1 %vm535_vm2, %v645_v32 }
 0x366   : > { %1605 = vmatprep.mubr.msk.bf16.mxu1 %vm1826_vm0, %v1825_v1  ;;  %1604 = vmatpush3.bf16.msra.mxu1 %v759_v49 }
 0x367   : > { %1615 = vmatprep.subr.bf16.mxu1 %v1825_v1 }
 0x41d   : > { %v637_v33 = vpop.f32.mrf.mxu1 }
 0x41e   : > { %v643_v58 = vpack.c.bf16 %v637_v33, %v637_v33 }
 0x41f   : > { %v1589_v34 = vpop.f32.mrf.mxu1 }
 0x421   : > { %v640_v35 = vpop.f32.mrf.mxu1 }
 0x422   : > { %v460_v35 = vld [vmem:[%s2220_s3 + $0x8] sm:$0xf] }
 0x423   : > { %v1590_v36 = vpop.f32.mrf.mxu1 }
 0x424   : > { %v962_v36 = vsel %vm599_vm3, %v460_v35, 0  ;;  %v1511_v35 = vld [vmem:[%s2201_s5] ss:$0 sm:$0xff] }
 0x425   : > { %v688_v37 = vpop.f32.mrf.mxu1 }
 0x426   : > { %v689_v38 = vadd.f32 %v2002_v14, %v688_v37 }
 0x427   : > { %v1595_v39 = vpop.f32.mrf.mxu1 }
 0x428   : > { %v694_v40 = vsel %vm535_vm2, %v689_v38, -inf }
 0x429   : > { %695 = vmax.xlane.f32.xlu1 %v694_v40  ;;  %v691_v41 = vpop.f32.mrf.mxu1 }
 0x42b   : > { %v1596_v42 = vpop.f32.mrf.mxu1 }
 0x4b2   : > { %v696_v43 = vpop.xlane.xlu1 %695 }
 0x4b3   : > { %v697_v44 = vsub.f32 %v689_v38, %v696_v43 }
 0x4b5   : > { %v698_v45 = vmul.f32 1.442695, %v697_v44 }
 0x4b7   : > { %1747 = vpow2.f32 %v698_v45 }
 0x4c4   : > { %v1748_v46 = vpop.eup %1747 }
 0x4c5   : > { %v700_v47 = vsel %vm535_vm2, %v1748_v46, 0.0 }
 0x4c6   : > { %701 = vadd.xlane.f32.xlu0 %v700_v47 }
 0x4dc   : > { %706 = vrot.lane.b32.xlu0 %v1986_v6, %s1831_s20  ;;  %s1835_s20 = smov 72  }
 0x4e0   : > { %849 = vrot.lane.b32.xlu0 %v1986_v6, %s1832_s21  ;;  %s1836_s21 = smov 104  }
 0x4e4   : > { %847 = vrot.lane.b32.xlu0 %v1986_v6, %s1833_s22 }
 0x54f   : > { %v702_v50 = vpop.xlane.xlu0 %701 }
 0x550   : > { %1749 = vrcp.f32 %v702_v50 }
 0x553   : > { %v707_v51 = vpop.permute.xlu0 %706 }
 0x554   : > { %v712_v52 = vsel %vm599_vm3, %v707_v51, 0 }
 0x555   : > { %1598 = vmatpush3.bf16.msra.mxu0 %v712_v52 }
 0x556   : > { %1609 = vmatprep.subr.bf16.mxu0 %v1825_v1 }
 0x557   : > { %v850_v59 = vpop.permute.xlu0 %849 }
 0x558   : > { %v855_v63 = vsel %vm535_vm2, %v850_v59, 0 }
 0x55b   : > { %v848_v5 = vpop.permute.xlu0 %847 }
 0x55d   : > { %v1750_v53 = vpop.eup %1749 }
 0x55e   : > { %v704_v55 = vmul.f32 %v1750_v53, %v1748_v46 }
 0x560   : > { %v705_v56 = vpack.c.bf16 %v704_v55, %v704_v55 }
 0x562   : > { %1600 = vmatmul.mubr.msk.bf16.vlgmr.msra.gmra.mxu0 %vm535_vm2, %v705_v56  ;;  %v461_v56 = vld [vmem:[%s2220_s3 + $0xc] sm:$0xf]  ;;  %s1418_s3 = scalar_lea.hbm %s2209_s13, %s1529_s23 }
 0x563   : > { %1610 = vmatpush3.bf16.msra.mxu0 %v805_v57  ;;  %1611 = vmatprep.mubr.msk.bf16.mxu0 %vm1826_vm0, %v1825_v1  ;;  %v1120_v57 = vsel %vm599_vm3, %v461_v56, 0 }
 0x564   : > { %1621 = vmatprep.subr.bf16.mxu0 %v1825_v1 }
 0x56a   : > { %1612 = vmatmul.mubr.msk.bf16.vlgmr.msra.gmra.mxu0 %vm535_vm2, %v643_v58 }
 0x56b   : > { %1623 = vmatprep.mubr.msk.bf16.mxu0 %vm1826_vm0, %v1825_v1 }
 0x622   : > { %v748_v60 = vpop.f32.mrf.mxu0 }
 0x623   : > { %v754_v61 = vpack.c.bf16 %v748_v60, %v748_v60 }
 0x624   : > { %v1601_v62 = vpop.f32.mrf.mxu0 }
 0x625   : > { %1606 = vmatmul.mubr.msk.bf16.vlgmr.msra.gmra.mxu1 %vm535_vm2, %v754_v61 }
 0x626   : > { %1616 = vmatpush3.bf16.xpose.msra.mxu1 %v855_v63  ;;  %v751_v0 = vpop.f32.mrf.mxu0  ;;  %1617 = vmatprep.mubr.msk.bf16.mxu1 %vm1826_vm0, %v1825_v1 }
 0x627   : > { %1627 = vmatprep.subr.bf16.mxu1 %v1825_v1 }
 0x628   : > { %v1602_v2 = vpop.f32.mrf.mxu0 }
 0x62a   : > { %v2046_v4 = vpop.f32.mrf.mxu0 }
 0x62c   : > { %v1613_v7 = vpop.f32.mrf.mxu0 }
 0x62d   : > { %1618 = vmatmul.mubr.msk.bf16.vlgmr.msra.gmra.mxu1 %vm535_vm2, %v848_v5 }
 0x62e   : > { %v844_v8 = vpop.f32.mrf.mxu0  ;;  %1629 = vmatprep.mubr.msk.bf16.mxu1 %vm1826_vm0, %v1825_v1  ;;  %1628 = vmatpush3.bf16.msra.mxu1 %v962_v36 }
 0x62f   : > { %1639 = vmatprep.subr.bf16.mxu1 %v1825_v1 }
 0x630   : > { %v1614_v9 = vpop.f32.mrf.mxu0 }
 0x631   : > { %v1510_v9 = vld [vmem:[%s2221_s4] ss:$0 sm:$0xff]  ;;  %s1407_s4 = scalar_lea.sflag [#allocation3], %s440_s15 }
 0x6e5   : > { %v2051_v10 = vpop.f32.mrf.mxu1 }
 0x6e7   : > { %v1607_v11 = vpop.f32.mrf.mxu1 }
 0x6e9   : > { %v798_v12 = vpop.f32.mrf.mxu1 }
 0x6eb   : > { %v1608_v13 = vpop.f32.mrf.mxu1 }
 0x6ed   : > { %v891_v15 = vpop.f32.mrf.mxu1 }
 0x6ee   : > { %v892_v16 = vadd.f32 %v2002_v14, %v891_v15 }
 0x6ef   : > { %v1619_v17 = vpop.f32.mrf.mxu1 }
 0x6f0   : > { %v897_v18 = vsel %vm535_vm2, %v892_v16, -inf }
 0x6f1   : > { %898 = vmax.xlane.f32.xlu1 %v897_v18  ;;  %v894_v19 = vpop.f32.mrf.mxu1 }
 0x6f3   : > { %v1620_v20 = vpop.f32.mrf.mxu1 }
 0x702   : > { %909 = vrot.lane.b32.xlu1 %v1986_v6, %s1834_s16 }
 0x706   : > { %1007 = vrot.lane.b32.xlu1 %v1986_v6, %s1835_s20  ;;  %s1838_s20 = smov [#allocation2]  }
 0x70a   : > { %1005 = vrot.lane.b32.xlu1 %v1986_v6, %s1836_s21  ;;  %s1767_s21 = sshll.u32 %s1838_s20, 4  ;;  %s1768_s21 = int_to_ptr.vmem [resolvable:$false] %s1767_s21 }
 0x70b   : > { %s1769_s29 = scalar_lea.vmem %s1768_s21, 256 }
 0x77a   : > { %v899_v21 = vpop.xlane.xlu1 %898 }
 0x77b   : > { %v900_v22 = vsub.f32 %v892_v16, %v899_v21 }
 0x77d   : > { %v901_v23 = vmul.f32 1.442695, %v900_v22 }
 0x77e   : > { %v910_v24 = vpop.permute.xlu1 %909 }
 0x77f   : > { %1751 = vpow2.f32 %v901_v23  ;;  %v915_v25 = vsel %vm599_vm3, %v910_v24, 0  ;;  %v1733_v24 = vld [vmem:[%s2203_s7 + $0x8] sm:$0xff]  }
 0x780   : > { %1622 = vmatpush3.bf16.msra.mxu0 %v915_v25  ;;  %v1735_v25 = vld [vmem:[%s2205_s9 + $0x38] sm:$0xff]  }
 0x781   : > { %1633 = vmatprep.subr.bf16.mxu0 %v1825_v1 }
 0x782   : > { %v1008_v31 = vpop.permute.xlu1 %1007 }
 0x783   : > { %v1013_v33 = vsel %vm535_vm2, %v1008_v31, 0 }
 0x786   : > { %v1006_v34 = vpop.permute.xlu1 %1005 }
 0x78c   : > { %v1752_v26 = vpop.eup %1751 }
 0x78d   : > { %v903_v27 = vsel %vm535_vm2, %v1752_v26, 0.0 }
 0x78e   : > { %904 = vadd.xlane.f32.xlu0 %v903_v27  ;;  %v1737_v27 = vld [vmem:[%s2205_s9 + $0x28] sm:$0xff]  }
 0x817   : > { %v905_v28 = vpop.xlane.xlu0 %904 }
 0x818   : > { %1753 = vrcp.f32 %v905_v28  ;;  %v1738_v28 = vld [vmem:[%s2205_s9 + $0x20] sm:$0xff]  }
 0x825   : > { %v1754_v29 = vpop.eup %1753 }
 0x826   : > { %v907_v30 = vmul.f32 %v1754_v29, %v1752_v26  ;;  %v1736_v26 = vld [vmem:[%s2205_s9 + $0x30] sm:$0xff]   ;;  %v1739_v29 = vld [vmem:[%s2205_s9 + $0x18] sm:$0xff]  }
 0x828   : > { %v908_v32 = vpack.c.bf16 %v907_v30, %v907_v30  ;;  %v1740_v30 = vld [vmem:[%s2205_s9 + $0x10] sm:$0xff]  }
 0x82a   : > { %1624 = vmatmul.mubr.msk.bf16.vlgmr.msra.gmra.mxu0 %vm535_vm2, %v908_v32 }
 0x82b   : > { %1634 = vmatpush3.bf16.xpose.msra.mxu0 %v1013_v33  ;;  %1635 = vmatprep.mubr.msk.bf16.mxu0 %vm1826_vm0, %v1825_v1 }
 0x82c   : > { %1645 = vmatprep.subr.bf16.mxu0 %v1825_v1 }
 0x832   : > { %1636 = vmatmul.mubr.msk.bf16.vlgmr.msra.gmra.mxu0 %vm535_vm2, %v1006_v34 }
 0x833   : > { %1647 = vmatprep.mubr.msk.bf16.mxu0 %vm1826_vm0, %v1825_v1  ;;  %1646 = vmatpush3.bf16.msra.mxu0 %v1120_v57 }
 0x834   : > { %1659 = vmatprep.subr.bf16.mxu0 %v1825_v1 }
 0x8ea   : > { %v951_v37 = vpop.f32.mrf.mxu0 }
 0x8eb   : > { %v957_v38 = vpack.c.bf16 %v951_v37, %v951_v37  ;;  %v1512_v37 = vld [vmem:[%s2202_s6] ss:$0 sm:$0xff] }
 0x8ec   : > { %v1625_v39 = vpop.f32.mrf.mxu0 }
 0x8ed   : > { %1630 = vmatmul.mubr.msk.bf16.vlgmr.msra.gmra.mxu1 %vm535_vm2, %v957_v38 }
 0x8ee   : > { %v954_v40 = vpop.f32.mrf.mxu0  ;;  %1641 = vmatprep.mubr.msk.bf16.mxu1 %vm1826_vm0, %v1825_v1 }
 0x8f0   : > { %v1626_v41 = vpop.f32.mrf.mxu0 }
 0x8f1   : > { %v1741_v41 = vld [vmem:[%s2205_s9 + $0x8] sm:$0xff]  }
 0x8f2   : > { %v1049_v42 = vpop.f32.mrf.mxu0 }
 0x8f3   : > { %v1050_v43 = vadd.f32 %v2002_v14, %v1049_v42  ;;  %v842_v14 = vadd.f32 %v2046_v4, %v2051_v10  ;;  %v1742_v42 = vld [vmem:[%s2205_s9] sm:$0xff]  }
 0x8f4   : > { %v1637_v44 = vpop.f32.mrf.mxu0 }
 0x8f5   : > { %v1055_v45 = vsel %vm535_vm2, %v1050_v43, -inf }
 0x8f6   : > { %1056 = vmax.xlane.f32.xlu1 %v1055_v45  ;;  %v1052_v46 = vpop.f32.mrf.mxu0 }
 0x8f8   : > { %v1638_v47 = vpop.f32.mrf.mxu0 }
 0x97f   : > { %v1057_v48 = vpop.xlane.xlu1 %1056 }
 0x980   : > { %v1058_v49 = vsub.f32 %v1050_v43, %v1057_v48  ;;  %v1513_v43 = vld [vmem:[%s2204_s8] ss:$0 sm:$0xff] }
 0x982   : > { %v1059_v50 = vmul.f32 1.442695, %v1058_v49 }
 0x984   : > { %1755 = vpow2.f32 %v1059_v50 }
 0x991   : > { %v1756_v51 = vpop.eup %1755 }
 0x992   : > { %v1061_v52 = vsel %vm535_vm2, %v1756_v51, 0.0 }
 0x993   : > { %1062 = vadd.xlane.f32.xlu0 %v1061_v52 }
 0x9a9   : > { %1067 = vrot.lane.b32.xlu0 %v1986_v6, %s1837_s30  ;;  %s442_s30 = scalar_lea.vmem [#allocation2], %s1492_s24 }
 0x9aa   : > { %s1420_s0 = sshll.u32 %s442_s30, 4  ;;  %s1421_s0 = int_to_ptr.vmem [resolvable:$true] %s1420_s0 }
 0x9ab   : > { %s1763_s16 = scalar_lea.vmem %s1421_s0, 128  ;;  %p1770_p0 = scmp.lt.s32.totalorder %s1421_s0, %s1768_s21 }
 0x9ac   : > { %p1764_p11 = scmp.ne.s32.totalorder %s1421_s0, %s1763_s16  ;;  %p1771_p1 = scmp.lt.s32.totalorder %s1769_s29, %s1763_s16 }
 0x9ad   : > { %v998_v53 = vpop.f32.mrf.mxu1 }
 0x9ae   : > { %v1004_v54 = vadd.f32 %v998_v53, %v842_v14  ;;  %p1765_p12 = pnand %p1764_p11, %p1947_p5  ;;  %p1772_p2 = por %p1771_p1, %p1770_p0 }
 0x9af   : > { %v1631_v55 = vpop.f32.mrf.mxu1 }
 0x9b0   : > { %p1766_p13 = pneg %p1765_p12 }
 0x9b1   : > { %v1001_v58 = vpop.f32.mrf.mxu1 }
 0x9b2   : > { %p1773_p3 = pnand %p1772_p2, %p1766_p13 }
 0x9b3   : > { %v1632_v59 = vpop.f32.mrf.mxu1 }
 0xa1c   : > { %v1063_v60 = vpop.xlane.xlu0 %1062 }
 0xa1d   : > { %1757 = vrcp.f32 %v1063_v60 }
 0xa20   : > { %v1068_v6 = vpop.permute.xlu0 %1067 }
 0xa21   : > { %v1073_v61 = vsel %vm599_vm3, %v1068_v6, 0 }
 0xa22   : > { %1640 = vmatpush3.bf16.msra.mxu1 %v1073_v61 }
 0xa23   : > { %1651 = vmatprep.subr.bf16.mxu1 %v1825_v1 }
 0xa2a   : > { %v1758_v62 = vpop.eup %1757 }
 0xa2b   : > { %v1065_v63 = vmul.f32 %v1758_v62, %v1756_v51 }
 0xa2d   : > { %v1066_v0 = vpack.c.bf16 %v1065_v63, %v1065_v63 }
 0xa2f   : > { %1642 = vmatmul.mubr.msk.bf16.vlgmr.msra.gmra.mxu1 %vm535_vm2, %v1066_v0 }
 0xa30   : > { %1655 = vmatprep.mubr.msk.bf16.mxu1 %vm1826_vm0, %v1825_v1  ;;  %1652 = vmatpush3.bf16.msra.mxu1 %v1733_v24 }
 0xa31   : > { %1653 = vmatprep.subr.bf16.mxu1 %v1825_v1 }
 0xaef   : > { %v1109_v2 = vpop.f32.mrf.mxu1 }
 0xaf0   : > { %v1115_v4 = vpack.c.bf16 %v1109_v2, %v1109_v2  ;;  %v1526_v2 = vld [vmem:[%s2207_s11] ss:$0 sm:$0xff] }
 0xaf1   : > { %v1643_v5 = vpop.f32.mrf.mxu1 }
 0xaf2   : > { %1648 = vmatmul.mubr.msk.bf16.vlgmr.msra.gmra.mxu0 %vm535_vm2, %v1115_v4  ;;  %v1527_v5 = vld [vmem:[%s2208_s12] ss:$0 sm:$0xff] }
 0xaf3   : > { %v1112_v7 = vpop.f32.mrf.mxu1  ;;  %1675 = vmatprep.mubr.msk.bf16.mxu0 %vm1826_vm0, %v1825_v1  ;;  %1660 = vmatpush3.bf16.msra.mxu0 %v1735_v25 }
 0xaf4   : > { %1661 = vmatprep.subr.bf16.mxu0 %v1825_v1 }
 0xaf5   : > { %v1644_v8 = vpop.f32.mrf.mxu1 }
 0xaf7   : > { %1662 = vmatpush3.bf16.msra.mxu0 %v1736_v26 }
 0xaf8   : > { %1663 = vmatprep.subr.bf16.mxu0 %v1825_v1 }
 0xafb   : > { %1664 = vmatpush3.bf16.msra.mxu0 %v1737_v27 }
 0xafc   : > { %1665 = vmatprep.subr.bf16.mxu0 %v1825_v1 }
 0xaff   : > { %1666 = vmatpush3.bf16.msra.mxu0 %v1738_v28 }
 0xb00   : > { %1667 = vmatprep.subr.bf16.mxu0 %v1825_v1 }
 0xb03   : > { %1668 = vmatpush3.bf16.msra.mxu0 %v1739_v29 }
 0xb04   : > { %1669 = vmatprep.subr.bf16.mxu0 %v1825_v1 }
 0xb07   : > { %1670 = vmatpush3.bf16.msra.mxu0 %v1740_v30 }
 0xb08   : > { %1671 = vmatprep.subr.bf16.mxu0 %v1825_v1 }
 0xb0b   : > { %1672 = vmatpush3.bf16.msra.mxu0 %v1741_v41 }
 0xb0c   : > { %1673 = vmatprep.subr.bf16.mxu0 %v1825_v1  ;;  %v1517_v1 = vld [vmem:[%s2206_s10] ss:$0 sm:$0xff] }
 0xb0f   : > { %1674 = vmatpush3.bf16.msra.mxu0 %v1742_v42 }
 0xbb2   : > { %v1156_v10 = vpop.f32.mrf.mxu0 }
 0xbb3   : > { %v1162_v11 = vadd.f32 %v1156_v10, %v1004_v54 }
 0xbb4   : > { %v1649_v12 = vpop.f32.mrf.mxu0 }
 0xbb5   : > { %v1169_v13 = vadd.f32 %v1510_v9, %v1162_v11 }
 0xbb6   : > { %v1159_v15 = vpop.f32.mrf.mxu0 }
 0xbb7   : > { %v1170_v16 = vadd.f32 %v1169_v13, %v1979_v3  ;;  %v1734_v3 = vld [vmem:[%s2203_s7] sm:$0xff]  }
 0xbb8   : > { %v1650_v17 = vpop.f32.mrf.mxu0  ;;  %1654 = vmatpush3.bf16.msra.mxu1 %v1734_v3 }
 0xbb9   : > { %v1171_v18 = vsel %vm481_vm1, %v1170_v16, 0.0 }
 0xbba   : > { %1172 = vadd.xlane.f32.xlu0 %v1171_v18 }
 0xc43   : > { %v1173_v19 = vpop.xlane.xlu0 %1172 }
 0xc44   : > { %v1175_v20 = vmul.f32 0.03125, %v1173_v19 }
 0xc46   : > { %v1176_v21 = vsub.f32 %v1170_v16, %v1175_v20 }
 0xc48   : > { %v1177_v22 = vmul.f32 %v1176_v21, %v1176_v21 }
 0xc4a   : > { %v1178_v23 = vsel %vm481_vm1, %v1177_v22, 0.0 }
 0xc4b   : > { %1179 = vadd.xlane.f32.xlu1 %v1178_v23 }
 0xcd4   : > { %v1180_v31 = vpop.xlane.xlu1 %1179 }
 0xcd5   : > { %v1181_v32 = vmul.f32 0.03125, %v1180_v31 }
 0xcd7   : > { %v1182_v33 = vadd.f32 1e-05, %v1181_v32 }
 0xcd9   : > { %1759 = vrsqrt.f32 %v1182_v33 }
 0xce6   : > { %v1760_v34 = vpop.eup %1759 }
 0xce7   : > { %v1184_v36 = vmul.f32 %v1760_v34, %v1176_v21 }
 0xce9   : > { %v1191_v38 = vmul.f32 %v1511_v35, %v1184_v36 }
 0xceb   : > { %v1198_v39 = vadd.f32 %v1512_v37, %v1191_v38 }
 0xced   : > { %v1199_v40 = vpack.c.bf16 %v1198_v39, %v1198_v39 }
 0xcef   : > { %1656 = vmatmul.mubr.msk.bf16.vlgmr.msra.gmra.mxu1 %vm481_vm1, %v1199_v40 }
 0xdaf   : > { %v1259_v44 = vpop.f32.mrf.mxu1 }
 0xdb0   : > { %v1260_v45 = vadd.f32 %v1513_v43, %v1259_v44 }
 0xdb1   : > { %v1657_v46 = vpop.f32.mrf.mxu1 }
 0xdb2   : > { %v1265_v47 = vmax.f32 %v1260_v45, 0.0 }
 0xdb3   : > { %v1262_v48 = vpop.f32.mrf.mxu1 }
 0xdb4   : > { %v1266_v49 = vpack.c.bf16 %v1265_v47, %v1265_v47 }
 0xdb5   : > { %v1658_v50 = vpop.f32.mrf.mxu1 }
 0xdb6   : > { %1676 = vmatmul.mubr.bf16.vlgmr.msra.gmra.mxu0 %v1266_v49 }
 0xe76   : > { %v1371_v51 = vpop.f32.mrf.mxu0 }
 0xe77   : > { %v1372_v52 = vadd.f32 %v1517_v1, %v1371_v51 }
 0xe78   : > { %v1677_v14 = vpop.f32.mrf.mxu0 }
 0xe79   : > { %v1377_v53 = vadd.f32 %v1372_v52, %v1198_v39 }
 0xe7a   : > { %v1374_v54 = vpop.f32.mrf.mxu0 }
 0xe7b   : > { %v1378_v55 = vsel %vm481_vm1, %v1377_v53, 0.0 }
 0xe7c   : > { %1379 = vadd.xlane.f32.xlu1 %v1378_v55  ;;  %v1678_v56 = vpop.f32.mrf.mxu0 }
 0xf05   : > { %v1380_v57 = vpop.xlane.xlu1 %1379 }
 0xf06   : > { %v1381_v58 = vmul.f32 0.03125, %v1380_v57 }
 0xf08   : > { %v1382_v59 = vsub.f32 %v1377_v53, %v1381_v58 }
 0xf0a   : > { %v1383_v60 = vmul.f32 %v1382_v59, %v1382_v59 }
 0xf0c   : > { %v1384_v6 = vsel %vm481_vm1, %v1383_v60, 0.0 }
 0xf0d   : > { %1385 = vadd.xlane.f32.xlu1 %v1384_v6 }
 0xf96   : > { %v1386_v61 = vpop.xlane.xlu1 %1385 }
 0xf97   : > { %v1387_v62 = vmul.f32 0.03125, %v1386_v61 }
 0xf99   : > { %v1388_v63 = vadd.f32 1e-05, %v1387_v62 }
 0xf9b   : > { %1761 = vrsqrt.f32 %v1388_v63 }
 0xfa8   : > { %v1762_v0 = vpop.eup %1761 }
 0xfa9   : > { %v1390_v4 = vmul.f32 %v1762_v0, %v1382_v59 }
 0xfab   : > { %v1397_v7 = vmul.f32 %v1526_v2, %v1390_v4 }
 0xfad   : > { %v1404_v8 = vadd.f32 %v1527_v5, %v1397_v7 }
 0xfaf   : > { %1405 = vst.msk [vmem:[%s442_s30] sm:$0xff] %vm481_vm1, %v1404_v8 }
 0xfb0   : > { %1776 = shalt.err (!%p1773_p3)
}
 0xfb1   : > { %s1777_s1 = scalar_lea.hbm %s1418_s3, 128  ;;  %s1781_s24 = scalar_lea.hbm %s2209_s13, 256 }
 0xfb2   : > { %p1778_p4 = scmp.ne.s32.totalorder %s1418_s3, %s1777_s1  ;;  %p1782_p9 = scmp.lt.s32.totalorder %s1418_s3, %s2209_s13 }
 0xfb3   : > { %p1783_p10 = scmp.lt.s32.totalorder %s1781_s24, %s1777_s1 }
 0xfb4   : > { %p1779_p7 = pnand %p1778_p4, %p1947_p5 }
 0xfb5   : > { %p1784_p11 = por %p1783_p10, %p1782_p9 }
 0xfb6   : > { %p1780_p8 = pneg %p1779_p7 }
 0xfb8   : > { %p1785_p12 = pnand %p1784_p11, %p1780_p8 }
 0xfba   : > { %1788 = shalt.err (!%p1785_p12)
}
 0xfbb   : > { %1679 = dma.vmem_to_hbm [thread:$0]  (%p1947_p5), %s1421_s0, 128, %s1418_s3, %s1407_s4  }
 0xfbc PF: > { %p1685_p13 = scmp.ge.s32.totalorder %s1823_s28, 2  ;;  %s1432_s30 = sand.u32 1, %s1811_s25  }
 0xfbd   : > { %s1433_s16 = scalar_lea.sflag [#allocation3], %s1432_s30 }
 0xfbe   : > { %p1682_p0 = pnand %p1685_p13, %p1951_p6 }
 0xfc0   : > { %p1683_p1 = pneg %p1682_p0 }
 0xfc2   : > { %1806 = dma.done.wait (%p1683_p1), %s1433_s16, 128  }
 0xfc3   : > { %1808 = vsyncadd (%p1683_p1), %s1433_s16, 4294967168  ;;  %p23_p2 = scmp.ge.s32.totalorder %s1934_s14, 4   ;;  %s2222_s25 = smov %s1815_s26 }
 0xfc4   : > { %s2223_s26 = smov %s1819_s27  ;;  %s2224_s27 = smov %s1945_s17 }
 0xfc5   : > { %s2225_s28 = smov %s1934_s14  ;;  %25 = sbr.rel (!%p23_p2) target bundleno = 9 (0x9), region = 110 }
 0xfca   :  { %1438 = vsyncpa [#allocation3], 1 }
 0xfcb   :  { %1440 = vsyncpa [#allocation3 + $0x1], 1 }

</bundles_post_ra>
